<compile_context>
chip_gen: v7x
topology: tpu7x:2x2x1
jax: 0.10.0
libtpu: 0.0.40
codegen_flags: <defaults>
</compile_context>

<pallas_src>
import jax
import jax.numpy as jnp
from jax.experimental import pallas as pl
from jax.experimental.pallas import tpu as pltpu

D0, D1, D2, D3 = 2000, 200, 20, 3        # scaled-down (module: 40000, 4000, 400, 3)
D1P, D2P, D3P = 256, 128, 128            # lane-padded (multiples of 128)
BN_EPS = 1e-5


def li_mlp_kernel(x_ref,
                  w1_ref, b1_ref,
                  w2_ref, b2_ref,
                  w3_ref, b3_ref,
                  o_ref):
    """Fused MLP block for one batch tile: (dot + bias + ReLU) x2 + head dot.

    BN is already folded into the weights/biases and all hidden/output dims
    are zero-padded to lane width.  Matmuls run bf16 x bf16 on the MXU with
    f32 accumulation; bias/ReLU elementwise math is done in f32 on the
    accumulator, then recast to bf16 for the next MXU pass.
    """
    x = x_ref[...]                                            # (tb, D0) bf16

    z1 = jnp.dot(x, w1_ref[...], preferred_element_type=jnp.float32) + b1_ref[...]
    h1 = jnp.maximum(z1, 0.0).astype(jnp.bfloat16)            # (tb, D1P)

    z2 = jnp.dot(h1, w2_ref[...], preferred_element_type=jnp.float32) + b2_ref[...]
    h2 = jnp.maximum(z2, 0.0).astype(jnp.bfloat16)            # (tb, D2P)

    o_ref[...] = (jnp.dot(h2, w3_ref[...], preferred_element_type=jnp.float32)
                  + b3_ref[...]).astype(o_ref.dtype)          # (tb, D3P) f32


def fold_params(params):
    """One-time weight prep: fold eval-mode BatchNorm into Linear weights and
    zero-pad hidden/output dims to multiples of 128 (exact no-op padding).

      y = ((x@w + b) - m) / sqrt(v+eps) * g + beta
        =  x @ (w * s) + ((b - m) * s + beta),   s = g / sqrt(v+eps)

    Weights are cast to bf16 (native MXU input on v5e/v6e/v7x); biases stay
    f32 since they are added to the f32 accumulator in-kernel.
    """
    (w1, b1, g1, be1, m1, v1,
     w2, b2, g2, be2, m2, v2,
     w3, b3) = params

    s1 = g1 / jnp.sqrt(v1 + BN_EPS)
    s2 = g2 / jnp.sqrt(v2 + BN_EPS)

    w1f = w1 * s1[None, :]
    b1f = (b1 - m1) * s1 + be1
    w2f = w2 * s2[None, :]
    b2f = (b2 - m2) * s2 + be2

    # Zero padding is exact: padded columns produce z=0+0, ReLU(0)=0, and the
    # following layer's padded rows are zero, so nothing leaks into live lanes.
    w1f = jnp.pad(w1f, ((0, 0), (0, D1P - D1))).astype(jnp.bfloat16)            # (D0, 256)
    b1f = jnp.pad(b1f, (0, D1P - D1)).astype(jnp.float32)[None, :]              # (1, 256)
    w2f = jnp.pad(w2f, ((0, D1P - D1), (0, D2P - D2))).astype(jnp.bfloat16)     # (256, 128)
    b2f = jnp.pad(b2f, (0, D2P - D2)).astype(jnp.float32)[None, :]              # (1, 128)
    w3f = jnp.pad(w3, ((0, D2P - D2), (0, D3P - D3))).astype(jnp.bfloat16)      # (128, 128)
    b3f = jnp.pad(b3, (0, D3P - D3)).astype(jnp.float32)[None, :]               # (1, 128)
    return (w1f, b1f, w2f, b2f, w3f, b3f)


def li_model_forward(x, folded_params, *, tile_b=128):
    """Batch-tiled fused forward.  x: (B, D0) f32 (or bf16) -> (B, 3) f32."""
    w1f, b1f, w2f, b2f, w3f, b3f = folded_params

    B = x.shape[0]
    # Batch tile: at most `tile_b`, at least 8 (sublane), multiple of 8.
    tb = min(tile_b, max(8, pl.cdiv(B, 8) * 8))
    Bp = pl.cdiv(B, tb) * tb
    xb = x.astype(jnp.bfloat16)
    if Bp != B:
        xb = jnp.pad(xb, ((0, Bp - B), (0, 0)))
    grid = (Bp // tb,)

    # Weights/biases: constant block index -> fetched once, VMEM-resident.
    resident = lambda shape: pl.BlockSpec(shape, lambda i: (0, 0))

    out = pl.pallas_call(
        li_mlp_kernel,
        out_shape=jax.ShapeDtypeStruct((Bp, D3P), jnp.float32),
        grid=grid,
        in_specs=[
            pl.BlockSpec((tb, D0), lambda i: (i, 0)),    # x: pipelined over batch
            resident((D0, D1P)), resident((1, D1P)),     # w1, b1
            resident((D1P, D2P)), resident((1, D2P)),    # w2, b2
            resident((D2P, D3P)), resident((1, D3P)),    # w3, b3
        ],
        out_specs=pl.BlockSpec((tb, D3P), lambda i: (i, 0)),   # lane-dense (128) store
        compiler_params=pltpu.CompilerParams(
            dimension_semantics=("parallel",)),          # v7x: shard tiles over 2 TCs
    )(xb, w1f, b1f, w2f, b2f, w3f, b3f)

    return out[:B, :D3]


def li_model_reference(x, params):
    """Pure-JAX f32 reference (eval-mode semantics of the original module)."""
    (w1, b1, g1, be1, m1, v1,
     w2, b2, g2, be2, m2, v2,
     w3, b3) = params
    h = x @ w1 + b1
    h = (h - m1) / jnp.sqrt(v1 + BN_EPS) * g1 + be1
    h = jnp.maximum(h, 0.0)
    h = h @ w2 + b2
    h = (h - m2) / jnp.sqrt(v2 + BN_EPS) * g2 + be2
    h = jnp.maximum(h, 0.0)
    return h @ w3 + b3


def li_model_reference_folded(x, folded_params):
    """Pure-JAX reference with the SAME bf16 folded/padded params and f32
    accumulation as the kernel — isolates kernel correctness from bf16
    quantization."""
    w1f, b1f, w2f, b2f, w3f, b3f = folded_params
    xb = x.astype(jnp.bfloat16)
    z1 = jnp.dot(xb, w1f, preferred_element_type=jnp.float32) + b1f
    h1 = jnp.maximum(z1, 0.0).astype(jnp.bfloat16)
    z2 = jnp.dot(h1, w2f, preferred_element_type=jnp.float32) + b2f
    h2 = jnp.maximum(z2, 0.0).astype(jnp.bfloat16)
    out = jnp.dot(h2, w3f, preferred_element_type=jnp.float32) + b3f
    return out[:, :D3]


def init_params(key):
    """Deterministic parameter init (PyTorch-style uniform(-1/sqrt(fan_in), ...))."""
    ks = jax.random.split(key, 13)

    def linear(k, fan_in, fan_out):
        kw, kb = jax.random.split(k)
        bound = 1.0 / jnp.sqrt(fan_in)
        w = jax.random.uniform(kw, (fan_in, fan_out), jnp.float32, -bound, bound)
        b = jax.random.uniform(kb, (fan_out,), jnp.float32, -bound, bound)
        return w, b

    w1, b1 = linear(ks[0], D0, D1)
    w2, b2 = linear(ks[1], D1, D2)
    w3, b3 = linear(ks[2], D2, D3)

    # Non-trivial (but deterministic) BatchNorm params so the fold is exercised.
    g1 = 1.0 + 0.1 * jax.random.normal(ks[3], (D1,), jnp.float32)
    be1 = 0.1 * jax.random.normal(ks[4], (D1,), jnp.float32)
    m1 = 0.05 * jax.random.normal(ks[5], (D1,), jnp.float32)
    v1 = jnp.ones((D1,), jnp.float32) * 0.9

    g2 = 1.0 + 0.1 * jax.random.normal(ks[6], (D2,), jnp.float32)
    be2 = 0.1 * jax.random.normal(ks[7], (D2,), jnp.float32)
    m2 = 0.05 * jax.random.normal(ks[8], (D2,), jnp.float32)
    v2 = jnp.ones((D2,), jnp.float32) * 1.1

    return (w1, b1, g1, be1, m1, v1,
            w2, b2, g2, be2, m2, v2,
            w3, b3)


if __name__ == "__main__":
    key = jax.random.PRNGKey(0)
    kx, kp = jax.random.split(key)

    batch = 256                                   # 2 batch tiles of 128 -> exercises grid
    x = jax.random.normal(kx, (batch, D0), jnp.float32)
    params = init_params(kp)

    # One-time weight prep (BN fold + lane padding + bf16 cast), cached outside
    # the forward.
    folded = fold_params(params)

    out = li_model_forward(x, folded)
    out = jax.block_until_ready(out)
    assert out.shape == (batch, D3)

    # 1) Kernel correctness vs a bit-comparable reference (same bf16/padded params).
    ref_bf16 = li_model_reference_folded(x, folded)
    assert jnp.allclose(out, ref_bf16, atol=5e-3, rtol=5e-3), \
        "mismatch vs bf16-matched reference"

    # 2) Sanity vs the full f32 eval-mode semantics of the original module
    #    (loose tolerance covers bf16 weight/activation quantization).
    ref_f32 = li_model_reference(x, params)
    assert jnp.allclose(out, ref_f32, atol=0.15, rtol=0.15), \
        "mismatch vs f32 eval-mode reference"

    print("KERNEL_OK")
</pallas_src>

<mosaic_0001>
module attributes {stable_mosaic.version = 11 : i64} {
  func.func @li_mlp_kernel(%arg0: i32, %arg1: memref<128x2000xbf16, #tpu.memory_space<vmem>>, %arg2: memref<2000x256xbf16, #tpu.memory_space<vmem>>, %arg3: memref<1x256xf32, #tpu.memory_space<vmem>>, %arg4: memref<256x128xbf16, #tpu.memory_space<vmem>>, %arg5: memref<1x128xf32, #tpu.memory_space<vmem>>, %arg6: memref<128x128xbf16, #tpu.memory_space<vmem>>, %arg7: memref<1x128xf32, #tpu.memory_space<vmem>>, %arg8: memref<128x128xf32, #tpu.memory_space<vmem>>) attributes {dimension_semantics = [#tpu.dimension_semantics<parallel>], iteration_bounds = array<i64: 2>, scalar_prefetch = 0 : i64, scratch_operands = 0 : i64, tpu.core_type = #tpu.core_type<tc>, window_params = [{transform_indices = @transform_0, window_bounds = array<i64: 128, 2000>}, {pipeline_mode = #tpu.pipeline_mode<synchronous>, transform_indices = @transform_1, window_bounds = array<i64: 2000, 256>}, {pipeline_mode = #tpu.pipeline_mode<synchronous>, transform_indices = @transform_2, window_bounds = array<i64: 1, 256>}, {pipeline_mode = #tpu.pipeline_mode<synchronous>, transform_indices = @transform_3, window_bounds = array<i64: 256, 128>}, {pipeline_mode = #tpu.pipeline_mode<synchronous>, transform_indices = @transform_4, window_bounds = array<i64: 1, 128>}, {pipeline_mode = #tpu.pipeline_mode<synchronous>, transform_indices = @transform_5, window_bounds = array<i64: 128, 128>}, {pipeline_mode = #tpu.pipeline_mode<synchronous>, transform_indices = @transform_6, window_bounds = array<i64: 1, 128>}, {transform_indices = @transform_7, window_bounds = array<i64: 128, 128>}]} {
    %c0 = arith.constant 0 : index
    %c0_0 = arith.constant 0 : index
    %0 = vector.load %arg1[%c0, %c0_0] : memref<128x2000xbf16, #tpu.memory_space<vmem>>, vector<128x2000xbf16>
    %c0_1 = arith.constant 0 : index
    %c0_2 = arith.constant 0 : index
    %1 = vector.load %arg2[%c0_1, %c0_2] : memref<2000x256xbf16, #tpu.memory_space<vmem>>, vector<2000x256xbf16>
    %cst = arith.constant dense<0.000000e+00> : vector<128x256xf32>
    %2 = tpu.matmul %0, %1, %cst {dimension_numbers = #tpu.dot_dimension_numbers<[1], [0], [0], [1], [0, 0, 1, 1], [], []>} : vector<128x2000xbf16>, vector<2000x256xbf16>, vector<128x256xf32> -> vector<128x256xf32>
    %c0_3 = arith.constant 0 : index
    %c0_4 = arith.constant 0 : index
    %3 = vector.load %arg3[%c0_3, %c0_4] : memref<1x256xf32, #tpu.memory_space<vmem>>, vector<1x256xf32>
    %4 = vector.broadcast %3 : vector<1x256xf32> to vector<128x256xf32>
    %5 = arith.addf %2, %4 : vector<128x256xf32>
    %cst_5 = arith.constant 0.000000e+00 : f32
    %6 = vector.broadcast %cst_5 : f32 to vector<128x256xf32>
    %7 = arith.maximumf %5, %6 : vector<128x256xf32>
    %8 = arith.truncf %7 : vector<128x256xf32> to vector<128x256xbf16>
    %c0_6 = arith.constant 0 : index
    %c0_7 = arith.constant 0 : index
    %9 = vector.load %arg4[%c0_6, %c0_7] : memref<256x128xbf16, #tpu.memory_space<vmem>>, vector<256x128xbf16>
    %cst_8 = arith.constant dense<0.000000e+00> : vector<128x128xf32>
    %10 = tpu.matmul %8, %9, %cst_8 {dimension_numbers = #tpu.dot_dimension_numbers<[1], [0], [0], [1], [0, 0, 1, 1], [], []>} : vector<128x256xbf16>, vector<256x128xbf16>, vector<128x128xf32> -> vector<128x128xf32>
    %c0_9 = arith.constant 0 : index
    %c0_10 = arith.constant 0 : index
    %11 = vector.load %arg5[%c0_9, %c0_10] : memref<1x128xf32, #tpu.memory_space<vmem>>, vector<1x128xf32>
    %12 = vector.broadcast %11 : vector<1x128xf32> to vector<128x128xf32>
    %13 = arith.addf %10, %12 : vector<128x128xf32>
    %cst_11 = arith.constant 0.000000e+00 : f32
    %14 = vector.broadcast %cst_11 : f32 to vector<128x128xf32>
    %15 = arith.maximumf %13, %14 : vector<128x128xf32>
    %16 = arith.truncf %15 : vector<128x128xf32> to vector<128x128xbf16>
    %c0_12 = arith.constant 0 : index
    %c0_13 = arith.constant 0 : index
    %17 = vector.load %arg6[%c0_12, %c0_13] : memref<128x128xbf16, #tpu.memory_space<vmem>>, vector<128x128xbf16>
    %cst_14 = arith.constant dense<0.000000e+00> : vector<128x128xf32>
    %18 = tpu.matmul %16, %17, %cst_14 {dimension_numbers = #tpu.dot_dimension_numbers<[1], [0], [0], [1], [0, 0, 1, 1], [], []>} : vector<128x128xbf16>, vector<128x128xbf16>, vector<128x128xf32> -> vector<128x128xf32>
    %c0_15 = arith.constant 0 : index
    %c0_16 = arith.constant 0 : index
    %19 = vector.load %arg7[%c0_15, %c0_16] : memref<1x128xf32, #tpu.memory_space<vmem>>, vector<1x128xf32>
    %20 = vector.broadcast %19 : vector<1x128xf32> to vector<128x128xf32>
    %21 = arith.addf %18, %20 : vector<128x128xf32>
    %c0_17 = arith.constant 0 : index
    %c0_18 = arith.constant 0 : index
    %22 = vector.load %arg8[%c0_17, %c0_18] : memref<128x128xf32, #tpu.memory_space<vmem>>, vector<128x128xf32>
    tpu.vector_store %arg8[%c0_17, %c0_18], %21 {strides = array<i32>} : memref<128x128xf32, #tpu.memory_space<vmem>>, vector<128x128xf32>,
    return
  }
  func.func @transform_0(%arg0: i32) -> (i32, i32) {
    %c0_i32 = arith.constant 0 : i32
    %c0_i32_0 = arith.constant 0 : i32
    return %arg0, %c0_i32 : i32, i32
  }
  func.func @transform_1(%arg0: i32) -> (i32, i32) {
    %c0_i32 = arith.constant 0 : i32
    %c0_i32_0 = arith.constant 0 : i32
    %c0_i32_1 = arith.constant 0 : i32
    return %c0_i32, %c0_i32_0 : i32, i32
  }
  func.func @transform_2(%arg0: i32) -> (i32, i32) {
    %c0_i32 = arith.constant 0 : i32
    %c0_i32_0 = arith.constant 0 : i32
    %c0_i32_1 = arith.constant 0 : i32
    return %c0_i32, %c0_i32_0 : i32, i32
  }
  func.func @transform_3(%arg0: i32) -> (i32, i32) {
    %c0_i32 = arith.constant 0 : i32
    %c0_i32_0 = arith.constant 0 : i32
    %c0_i32_1 = arith.constant 0 : i32
    return %c0_i32, %c0_i32_0 : i32, i32
  }
  func.func @transform_4(%arg0: i32) -> (i32, i32) {
    %c0_i32 = arith.constant 0 : i32
    %c0_i32_0 = arith.constant 0 : i32
    %c0_i32_1 = arith.constant 0 : i32
    return %c0_i32, %c0_i32_0 : i32, i32
  }
  func.func @transform_5(%arg0: i32) -> (i32, i32) {
    %c0_i32 = arith.constant 0 : i32
    %c0_i32_0 = arith.constant 0 : i32
    %c0_i32_1 = arith.constant 0 : i32
    return %c0_i32, %c0_i32_0 : i32, i32
  }
  func.func @transform_6(%arg0: i32) -> (i32, i32) {
    %c0_i32 = arith.constant 0 : i32
    %c0_i32_0 = arith.constant 0 : i32
    %c0_i32_1 = arith.constant 0 : i32
    return %c0_i32, %c0_i32_0 : i32, i32
  }
  func.func @transform_7(%arg0: i32) -> (i32, i32) {
    %c0_i32 = arith.constant 0 : i32
    %c0_i32_0 = arith.constant 0 : i32
    return %arg0, %c0_i32 : i32, i32
  }
}

</mosaic_0001>

<bundles_post_ra>
// kernel: tpu_custom_call.1
= control target key start
LH: loop header
LB: loop body
LE: loop exit
PB: predicated region body
PF: predicated region fallthrough
CT: control target
= control target key end

     0   :  { %12 = vsyncpa [#allocation3], 0  ;;  %s6611_s0 = inlined_call_operand.vmem [shape: bf16[256,2000], index: 0, kind: input, shape index: {}]   ;;  %s6612_s1 = inlined_call_operand.vmem [shape: bf16[2000,256], index: 1, kind: input, shape index: {}]   ;;  %s6613_s2 = inlined_call_operand.vmem [shape: f32[1,256], index: 2, kind: input, shape index: {}]   ;;  %s6614_s3 = inlined_call_operand.vmem [shape: bf16[256,128], index: 3, kind: input, shape index: {}]   ;;  %s6615_s4 = inlined_call_operand.vmem [shape: f32[1,128], index: 4, kind: input, shape index: {}]   ;;  %s6616_s5 = inlined_call_operand.vmem [shape: bf16[128,128], index: 5, kind: input, shape index: {}]   ;;  %s6617_s6 = inlined_call_operand.vmem [shape: f32[1,128], index: 6, kind: input, shape index: {}]   ;;  %s6618_s7 = inlined_call_operand.hbm [shape: f32[256,128], index: 7, kind: output, shape index: {}]  }
   0x1   :  { %14 = vsyncpa [#allocation3 + $0x1], 0  ;;  %s5391_s24 = smov 0   ;;  %s5393_s25 = smov 0  }
   0x2   :  { %s5395_s26 = smov 0   ;;  %s5397_s27 = smov 0  }
   0x3 LB: > { %s5412_s28 = sadd.s32 4294967295, %s5346_s27   ;;  %s4049_s29 = sadd.s32 4294967294, %s5346_s27   ;;  %s5346_s27 = sphi %s5397_s27, %s6624_s27   ;;  %s5342_s26 = sphi %s5395_s26, %s6623_s26   ;;  %s5338_s25 = sphi %s5393_s25, %s6622_s25   ;;  %s5334_s24 = sphi %s5391_s24, %s6621_s24  }
   0x4   : > { %s5416_s30 = sadd.s32 1, %s5346_s27   ;;  %s179_s8 = sadd.s32 1, %s5342_s26 }
   0x5   : > { %s176_s9 = ssub.s32 %s5346_s27, %s5416_s30  ;;  %p189_p0 = scmp.ne.s32.totalorder %s5342_s26, %s5338_s25 }
   0x6   : > { %p177_p1 = scmp.eq.s32.totalorder %s176_s9, 0  ;;  %p190_p2 = scmp.eq.s32.totalorder %s5412_s28, 1 }
   0x7   : > { %p195_p3 = scmp.ne.s32.totalorder %s5338_s25, %s5334_s24  ;;  %p196_p4 = scmp.eq.s32.totalorder %s4049_s29, 1 }
   0x8   : > { %s5427_s10 = scalar_select %p177_p1, %s5342_s26, %s179_s8  }
   0x9   : > { %p5429_p5 = por %p190_p2, %p189_p0  ;;  %p5433_p6 = por %p196_p4, %p195_p3 }
   0xa   : > { %p4052_p7 = scmp.ge.s32.totalorder %s5346_s27, 1  ;;  %p242_p8 = scmp.lt.s32.totalorder %s5346_s27, 3 }
   0xc   : > { %p243_p9 = pnand %p4052_p7, %p242_p8 }
   0xd   : > { %v4885_v0 = vld [vmem:[%s6612_s1 + $0x4] ss:$8 sps:$4 sm:$0xff] (!%p243_p9)   ;;  %v4889_v2 = vld [vmem:[%s6612_s1] ss:$8 sps:$4 sm:$0xff] (!%p243_p9)   ;;  %v4891_v4 = vld [vmem:[%s6612_s1 + $0x14] ss:$8 sps:$4 sm:$0xff] (!%p243_p9)  }
   0xe   : > { %246 = sbr.rel (%p243_p9) target bundleno = 1068 (0x42c), region = 48  ;;  %v4887_v1 = vld [vmem:[%s6612_s1 + $0x304] ss:$8 sps:$4 sm:$0xff] (!%p243_p9)   ;;  %2581 = vmatprep.subr.bf16.mxu1 (!%p243_p9), %v4885_v0  ;;  %v4890_v3 = vld [vmem:[%s6612_s1 + $0x300] ss:$8 sps:$4 sm:$0xff] (!%p243_p9)   ;;  %s4054_s17 = sshll.u32 (!%p243_p9), %s5412_s28, 4 }
   0xf   : > { %2920 = vmatprep.subr.bf16.mxu0 (!%p243_p9), %v4887_v1  ;;  %2582 = vmatpush1.bf16.msra.mxu1 (!%p243_p9), %v4889_v2  ;;  %v4893_v5 = vld [vmem:[%s6612_s1 + $0x314] ss:$8 sps:$4 sm:$0xff] (!%p243_p9)   ;;  %v4895_v6 = vld [vmem:[%s6612_s1 + $0x10] ss:$8 sps:$4 sm:$0xff] (!%p243_p9)   ;;  %v4897_v8 = vld [vmem:[%s6612_s1 + $0x24] ss:$8 sps:$4 sm:$0xff] (!%p243_p9)  }
  0x10   : > { %2921 = vmatpush1.bf16.msra.mxu0 (!%p243_p9), %v4890_v3  ;;  %2583 = vmatprep.subr.bf16.mxu1 (!%p243_p9), %v4891_v4  ;;  %v4896_v7 = vld [vmem:[%s6612_s1 + $0x310] ss:$8 sps:$4 sm:$0xff] (!%p243_p9)   ;;  %v4899_v9 = vld [vmem:[%s6612_s1 + $0x324] ss:$8 sps:$4 sm:$0xff] (!%p243_p9)   ;;  %v4901_v10 = vld [vmem:[%s6612_s1 + $0x20] ss:$8 sps:$4 sm:$0xff] (!%p243_p9)  }
  0x11   : > { %2922 = vmatprep.subr.bf16.mxu0 (!%p243_p9), %v4893_v5  ;;  %v4902_v11 = vld [vmem:[%s6612_s1 + $0x320] ss:$8 sps:$4 sm:$0xff] (!%p243_p9)   ;;  %v4903_v12 = vld [vmem:[%s6612_s1 + $0x34] ss:$8 sps:$4 sm:$0xff] (!%p243_p9)   ;;  %v4907_v14 = vld [vmem:[%s6612_s1 + $0x30] ss:$8 sps:$4 sm:$0xff] (!%p243_p9)  }
  0x12   : > { %v4905_v13 = vld [vmem:[%s6612_s1 + $0x334] ss:$8 sps:$4 sm:$0xff] (!%p243_p9)   ;;  %v4908_v15 = vld [vmem:[%s6612_s1 + $0x330] ss:$8 sps:$4 sm:$0xff] (!%p243_p9)   ;;  %v4909_v16 = vld [vmem:[%s6612_s1 + $0x44] ss:$8 sps:$4 sm:$0xff] (!%p243_p9)  }
  0x13   : > { %2584 = vmatpush1.bf16.msra.mxu1 (!%p243_p9), %v4895_v6  ;;  %v4911_v17 = vld [vmem:[%s6612_s1 + $0x344] ss:$8 sps:$4 sm:$0xff] (!%p243_p9)   ;;  %v4913_v18 = vld [vmem:[%s6612_s1 + $0x40] ss:$8 sps:$4 sm:$0xff] (!%p243_p9)   ;;  %v4915_v20 = vld [vmem:[%s6612_s1 + $0x54] ss:$8 sps:$4 sm:$0xff] (!%p243_p9)  }
  0x14   : > { %2923 = vmatpush1.bf16.msra.mxu0 (!%p243_p9), %v4896_v7  ;;  %2585 = vmatprep.subr.bf16.mxu1 (!%p243_p9), %v4897_v8  ;;  %v4914_v19 = vld [vmem:[%s6612_s1 + $0x340] ss:$8 sps:$4 sm:$0xff] (!%p243_p9)   ;;  %v4917_v21 = vld [vmem:[%s6612_s1 + $0x354] ss:$8 sps:$4 sm:$0xff] (!%p243_p9)   ;;  %v4919_v22 = vld [vmem:[%s6612_s1 + $0x50] ss:$8 sps:$4 sm:$0xff] (!%p243_p9)  }
  0x15   : > { %2924 = vmatprep.subr.bf16.mxu0 %v4899_v9  ;;  %v4920_v23 = vld [vmem:[%s6612_s1 + $0x350] ss:$8 sps:$4 sm:$0xff]   ;;  %v4921_v24 = vld [vmem:[%s6612_s1 + $0x64] ss:$8 sps:$4 sm:$0xff]   ;;  %v4925_v26 = vld [vmem:[%s6612_s1 + $0x60] ss:$8 sps:$4 sm:$0xff]  }
  0x16   : > { %v4923_v25 = vld [vmem:[%s6612_s1 + $0x364] ss:$8 sps:$4 sm:$0xff]   ;;  %v4926_v27 = vld [vmem:[%s6612_s1 + $0x360] ss:$8 sps:$4 sm:$0xff]   ;;  %v4927_v28 = vld [vmem:[%s6612_s1 + $0x74] ss:$8 sps:$4 sm:$0xff]  }
  0x17   : > { %2586 = vmatpush1.bf16.msra.mxu1 %v4901_v10  ;;  %v4929_v29 = vld [vmem:[%s6612_s1 + $0x374] ss:$8 sps:$4 sm:$0xff]   ;;  %v4931_v30 = vld [vmem:[%s6612_s1 + $0x70] ss:$8 sps:$4 sm:$0xff]   ;;  %v4933_v32 = vld [vmem:[%s6612_s1 + $0x84] ss:$8 sps:$4 sm:$0xff]  }
  0x18   : > { %2925 = vmatpush1.bf16.msra.mxu0 %v4902_v11  ;;  %2587 = vmatprep.subr.bf16.mxu1 %v4903_v12  ;;  %v4932_v31 = vld [vmem:[%s6612_s1 + $0x370] ss:$8 sps:$4 sm:$0xff]   ;;  %p276_p10 = scmp.lt.s32.totalorder %s4054_s17, 31  ;;  %v4935_v33 = vld [vmem:[%s6612_s1 + $0x384] ss:$8 sps:$4 sm:$0xff]   ;;  %vm2556_vm0 = vcmask 654336  }
  0x19   : > { %2926 = vmatprep.subr.bf16.mxu0 %v4905_v13  ;;  %v4937_v34 = vld [vmem:[%s6612_s1 + $0x80] ss:$8 sps:$4 sm:$0xff]   ;;  %v4939_v36 = vld [vmem:[%s6612_s1 + $0x94] ss:$8 sps:$4 sm:$0xff]   ;;  %v4943_v38 = vld [vmem:[%s6612_s1 + $0x90] ss:$8 sps:$4 sm:$0xff]  }
  0x1a   : > { %v4938_v35 = vld [vmem:[%s6612_s1 + $0x380] ss:$8 sps:$4 sm:$0xff]   ;;  %s6626_s17 = smov (!%p276_p10, %s4054_s17), 31  ;;  %v4941_v37 = vld [vmem:[%s6612_s1 + $0x394] ss:$8 sps:$4 sm:$0xff]   ;;  %s272_s16 = sand.u32 1, %s5338_s25  }
  0x1b   : > { %2588 = vmatpush1.bf16.msra.mxu1 %v4907_v14  ;;  %v4944_v39 = vld [vmem:[%s6612_s1 + $0x390] ss:$8 sps:$4 sm:$0xff]   ;;  %v4945_v40 = vld [vmem:[%s6612_s1 + $0xa4] ss:$8 sps:$4 sm:$0xff]   ;;  %s4474_s13 = sshll.u32 %s6626_s17, 6  ;;  %s4053_s18 = sshll.u32 %s272_s16, 7 }
  0x1c   : > { %2927 = vmatpush1.bf16.msra.mxu0 %v4908_v15  ;;  %2589 = vmatprep.subr.bf16.mxu1 %v4909_v16  ;;  %v4947_v41 = vld [vmem:[%s6612_s1 + $0x3a4] ss:$8 sps:$4 sm:$0xff]   ;;  %v4949_v42 = vld [vmem:[%s6612_s1 + $0xa0] ss:$8 sps:$4 sm:$0xff]   ;;  %s5575_s23 = scalar_lea.vmem %s6611_s0, %s4474_s13  ;;  %v4951_v44 = vld [vmem:[%s6612_s1 + $0xb4] ss:$8 sps:$4 sm:$0xff]  }
  0x1d   : > { %2928 = vmatprep.subr.bf16.mxu0 %v4911_v17  ;;  %v4950_v43 = vld [vmem:[%s6612_s1 + $0x3a0] ss:$8 sps:$4 sm:$0xff]   ;;  %v4953_v45 = vld [vmem:[%s6612_s1 + $0x3b4] ss:$8 sps:$4 sm:$0xff]   ;;  %v4955_v46 = vld [vmem:[%s6612_s1 + $0xb0] ss:$8 sps:$4 sm:$0xff]  }
  0x1e   : > { %v4956_v47 = vld [vmem:[%s6612_s1 + $0x3b0] ss:$8 sps:$4 sm:$0xff]   ;;  %v284_v48 = vld [vmem:[%s5575_s23] sm:$0xff]  ;;  %v4963_v58 = vld [vmem:[%s6612_s1 + $0xd4] ss:$8 sps:$4 sm:$0xff]   ;;  %s6541_s21 = scalar_lea.vmem [#allocation2], %s4053_s18 }
  0x1f   : > { %2590 = vmatpush1.bf16.msra.mxu1 %v4913_v18  ;;  %v292_v49 = vld [vmem:[%s5575_s23 + $0x40] sm:$0xff]  ;;  %v287_v50 = vld [vmem:[%s5575_s23 + $0x18] sm:$0xff]  ;;  %s4475_s22 = sshll.u32 %s5412_s28, 11  ;;  %s3987_s17 = sshll.u32 %s6541_s21, 4  ;;  %s6563_s17 = int_to_ptr.vmem [resolvable:$true] %s3987_s17 }
  0x20   : > { %2929 = vmatpush1.bf16.msra.mxu0 %v4914_v19  ;;  %2591 = vmatprep.subr.bf16.mxu1 %v4915_v20  ;;  %v295_v51 = vld [vmem:[%s5575_s23 + $0x58] sm:$0xff]  ;;  %v4957_v52 = vld [vmem:[%s6612_s1 + $0xc4] ss:$8 sps:$4 sm:$0xff]   ;;  %v4058_v53 = vcombine.high %v284_v48, %v292_v49  ;;  %v4961_v56 = vld [vmem:[%s6612_s1 + $0xc0] ss:$8 sps:$4 sm:$0xff]   ;;  %v4057_v11 = vcombine.low %v284_v48, %v292_v49  ;;  %s6561_s8 = scalar_lea.hbm %s6618_s7, %s4475_s22  ;;  %s6570_s28 = scalar_lea.sflag [#allocation3], %s272_s16 }
  0x21   : > { %2930 = vmatprep.subr.bf16.mxu0 %v4917_v21  ;;  %v4959_v54 = vld [vmem:[%s6612_s1 + $0x3c4] ss:$8 sps:$4 sm:$0xff]   ;;  %v4064_v55 = vcombine.high %v287_v50, %v295_v51  ;;  %v4962_v57 = vld [vmem:[%s6612_s1 + $0x3c0] ss:$8 sps:$4 sm:$0xff]   ;;  %v4965_v59 = vld [vmem:[%s6612_s1 + $0x3d4] ss:$8 sps:$4 sm:$0xff]   ;;  %v4063_v12 = vcombine.low %v287_v50, %v295_v51 }
  0x22   : > { %2613 = vmatprep.mubr.bf16.mxu1 %v4058_v53  ;;  %v4967_v60 = vld [vmem:[%s6612_s1 + $0xd0] ss:$8 sps:$4 sm:$0xff]   ;;  %v4969_v62 = vld [vmem:[%s6612_s1 + $0xe4] ss:$8 sps:$4 sm:$0xff]   ;;  %v4973_v0 = vld [vmem:[%s6612_s1 + $0xe0] ss:$8 sps:$4 sm:$0xff]  }
  0x23   : > { %2592 = vmatpush1.bf16.msra.mxu1 %v4919_v22  ;;  %2952 = vmatprep.mubr.bf16.mxu0 %v4064_v55  ;;  %v4968_v61 = vld [vmem:[%s6612_s1 + $0x3d0] ss:$8 sps:$4 sm:$0xff]   ;;  %v4971_v63 = vld [vmem:[%s6612_s1 + $0x3e4] ss:$8 sps:$4 sm:$0xff]   ;;  %v4974_v1 = vld [vmem:[%s6612_s1 + $0x3e0] ss:$8 sps:$4 sm:$0xff]  }
  0x24   : > { %2931 = vmatpush1.bf16.msra.mxu0 %v4920_v23  ;;  %2593 = vmatprep.subr.bf16.mxu1 %v4921_v24  ;;  %v4975_v2 = vld [vmem:[%s6612_s1 + $0xf4] ss:$8 sps:$4 sm:$0xff]   ;;  %v4979_v4 = vld [vmem:[%s6612_s1 + $0xf0] ss:$8 sps:$4 sm:$0xff]   ;;  %v4983_v6 = vld [vmem:[%s6612_s1 + $0x104] ss:$8 sps:$4 sm:$0xff]  }
  0x25   : > { %2932 = vmatprep.subr.bf16.mxu0 %v4923_v25  ;;  %v4977_v3 = vld [vmem:[%s6612_s1 + $0x3f4] ss:$8 sps:$4 sm:$0xff]   ;;  %v4980_v5 = vld [vmem:[%s6612_s1 + $0x3f0] ss:$8 sps:$4 sm:$0xff]   ;;  %v4986_v7 = vld [vmem:[%s6612_s1 + $0x404] ss:$8 sps:$4 sm:$0xff]  }
  0x26   : > { %v4981_v8 = vld [vmem:[%s6612_s1 + $0x100] ss:$8 sps:$4 sm:$0xff]   ;;  %v303_v14 = vld [vmem:[%s5575_s23 + $0x98] sm:$0xff]  ;;  %v4995_v22 = vld [vmem:[%s6612_s1 + $0x124] ss:$8 sps:$4 sm:$0xff]   ;;  %s5284_s9 = scalar_lea.vmem %s6563_s17, 2048 }
  0x27   : > { %2594 = vmatpush1.bf16.msra.mxu1 %v4925_v26  ;;  %v4984_v9 = vld [vmem:[%s6612_s1 + $0x400] ss:$8 sps:$4 sm:$0xff]   ;;  %v311_v15 = vld [vmem:[%s5575_s23 + $0xd8] sm:$0xff]  ;;  %v4998_v23 = vld [vmem:[%s6612_s1 + $0x424] ss:$8 sps:$4 sm:$0xff]   ;;  %p5285_p11 = scmp.ne.s32.totalorder %s6563_s17, %s5284_s9  ;;  %s5348_s14 = smov [#allocation2]  }
  0x28   : > { %2933 = vmatpush1.bf16.msra.mxu0 %v4926_v27  ;;  %2595 = vmatprep.subr.bf16.mxu1 %v4927_v28  ;;  %v300_v10 = vld [vmem:[%s5575_s23 + $0x80] sm:$0xff]  ;;  %v4989_v16 = vld [vmem:[%s6612_s1 + $0x114] ss:$8 sps:$4 sm:$0xff]   ;;  %v4080_v19 = vcombine.high %v303_v14, %v311_v15  ;;  %v4987_v20 = vld [vmem:[%s6612_s1 + $0x110] ss:$8 sps:$4 sm:$0xff]   ;;  %s5288_s15 = sshll.u32 %s5348_s14, 4  ;;  %s5289_s15 = int_to_ptr.vmem [resolvable:$false] %s5288_s15 }
  0x29   : > { %2934 = vmatprep.subr.bf16.mxu0 %v4929_v29  ;;  %v308_v13 = vld [vmem:[%s5575_s23 + $0xc0] sm:$0xff]  ;;  %v4992_v17 = vld [vmem:[%s6612_s1 + $0x414] ss:$8 sps:$4 sm:$0xff]   ;;  %v4990_v21 = vld [vmem:[%s6612_s1 + $0x410] ss:$8 sps:$4 sm:$0xff]   ;;  %v4079_v29 = vcombine.low %v303_v14, %v311_v15  ;;  %p5286_p12 = pnand %p5285_p11, %p5429_p5  ;;  %s5290_s13 = scalar_lea.vmem %s5289_s15, 4096 }
  0x2a   : > { %v4074_v18 = vcombine.high %v300_v10, %v308_v13  ;;  %v4993_v24 = vld [vmem:[%s6612_s1 + $0x120] ss:$8 sps:$4 sm:$0xff]   ;;  %v4073_v28 = vcombine.low %v300_v10, %v308_v13  ;;  %v5013_v48 = vld [vmem:[%s6612_s1 + $0x154] ss:$8 sps:$4 sm:$0xff]   ;;  %v5014_v53 = vld [vmem:[%s6612_s1 + $0x450] ss:$8 sps:$4 sm:$0xff]   ;;  %p5291_p0 = scmp.lt.s32.totalorder %s6563_s17, %s5289_s15  ;;  %p5292_p1 = scmp.lt.s32.totalorder %s5290_s13, %s5284_s9 }
  0x2b   : > { %2596 = vmatpush1.bf16.msra.mxu1 %v4931_v30  ;;  %v4996_v25 = vld [vmem:[%s6612_s1 + $0x420] ss:$8 sps:$4 sm:$0xff]   ;;  %v319_v30 = vld [vmem:[%s5575_s23 + $0x118] sm:$0xff]  ;;  %v5022_v55 = vld [vmem:[%s6612_s1 + $0x464] ss:$8 sps:$4 sm:$0xff]   ;;  %p5287_p13 = pneg %p5286_p12 }
  0x2c   : > { %2935 = vmatpush1.bf16.msra.mxu0 %v4932_v31  ;;  %2597 = vmatprep.subr.bf16.mxu1 %v4933_v32  ;;  %v316_v26 = vld [vmem:[%s5575_s23 + $0x100] sm:$0xff]  ;;  %v327_v31 = vld [vmem:[%s5575_s23 + $0x158] sm:$0xff]  ;;  %p5293_p2 = por %p5292_p1, %p5291_p0 }
  0x2d   : > { %2936 = vmatprep.subr.bf16.mxu0 %v4935_v33  ;;  %v324_v27 = vld [vmem:[%s5575_s23 + $0x140] sm:$0xff]  ;;  %v5001_v32 = vld [vmem:[%s6612_s1 + $0x134] ss:$8 sps:$4 sm:$0xff]  }
  0x2e   : > { %v5004_v33 = vld [vmem:[%s6612_s1 + $0x434] ss:$8 sps:$4 sm:$0xff]   ;;  %v5029_v14 = vld [vmem:[%s6612_s1 + $0x180] ss:$8 sps:$4 sm:$0xff]   ;;  %p5294_p3 = pnand %p5293_p2, %p5287_p13 }
  0x2f   : > { %2598 = vmatpush1.bf16.msra.mxu1 %v4937_v34  ;;  %v4090_v34 = vcombine.high %v316_v26, %v324_v27  ;;  %v5016_v49 = vld [vmem:[%s6612_s1 + $0x454] ss:$8 sps:$4 sm:$0xff]   ;;  %v5032_v15 = vld [vmem:[%s6612_s1 + $0x480] ss:$8 sps:$4 sm:$0xff]  }
  0x30   : > { %2937 = vmatpush1.bf16.msra.mxu0 %v4938_v35  ;;  %2599 = vmatprep.subr.bf16.mxu1 %v4939_v36  ;;  %v4096_v35 = vcombine.high %v319_v30, %v327_v31  ;;  %v4999_v36 = vld [vmem:[%s6612_s1 + $0x130] ss:$8 sps:$4 sm:$0xff]  }
  0x31   : > { %2938 = vmatprep.subr.bf16.mxu0 %v4941_v37  ;;  %v5002_v37 = vld [vmem:[%s6612_s1 + $0x430] ss:$8 sps:$4 sm:$0xff]  }
  0x32   : > { %v375_v13 = vld [vmem:[%s5575_s23 + $0x2d8] sm:$0xff] }
  0x33   : > { %2600 = vmatpush1.bf16.msra.mxu1 %v4943_v38  ;;  %v5007_v38 = vld [vmem:[%s6612_s1 + $0x144] ss:$8 sps:$4 sm:$0xff]  }
  0x34   : > { %2939 = vmatpush1.bf16.msra.mxu0 %v4944_v39  ;;  %2601 = vmatprep.subr.bf16.mxu1 %v4945_v40  ;;  %v5010_v39 = vld [vmem:[%s6612_s1 + $0x444] ss:$8 sps:$4 sm:$0xff]   ;;  %v5005_v40 = vld [vmem:[%s6612_s1 + $0x140] ss:$8 sps:$4 sm:$0xff]  }
  0x35   : > { %2940 = vmatprep.subr.bf16.mxu0 %v4947_v41  ;;  %v5008_v41 = vld [vmem:[%s6612_s1 + $0x440] ss:$8 sps:$4 sm:$0xff]  }
  0x37   : > { %2602 = vmatpush1.bf16.msra.mxu1 %v4949_v42  ;;  %v332_v42 = vld [vmem:[%s5575_s23 + $0x180] sm:$0xff] }
  0x38   : > { %2941 = vmatpush1.bf16.msra.mxu0 %v4950_v43  ;;  %2603 = vmatprep.subr.bf16.mxu1 %v4951_v44  ;;  %v340_v43 = vld [vmem:[%s5575_s23 + $0x1c0] sm:$0xff]  ;;  %v4089_v44 = vcombine.low %v316_v26, %v324_v27 }
  0x39   : > { %2942 = vmatprep.subr.bf16.mxu0 %v4953_v45  ;;  %v4095_v45 = vcombine.low %v319_v30, %v327_v31  ;;  %v4106_v50 = vcombine.high %v332_v42, %v340_v43  ;;  %v380_v26 = vld [vmem:[%s5575_s23 + $0x300] sm:$0xff]  ;;  %v383_v30 = vld [vmem:[%s5575_s23 + $0x318] sm:$0xff] }
  0x3a   : > { %v391_v31 = vld [vmem:[%s5575_s23 + $0x358] sm:$0xff] }
  0x3b   : > { %2604 = vmatpush1.bf16.msra.mxu1 %v4955_v46  ;;  %v335_v46 = vld [vmem:[%s5575_s23 + $0x198] sm:$0xff] }
  0x3c   : > { %2943 = vmatpush1.bf16.msra.mxu0 %v4956_v47  ;;  %2605 = vmatprep.subr.bf16.mxu1 %v4957_v52  ;;  %v343_v47 = vld [vmem:[%s5575_s23 + $0x1d8] sm:$0xff] }
  0x3d   : > { %2944 = vmatprep.subr.bf16.mxu0 %v4959_v54  ;;  %v4112_v51 = vcombine.high %v335_v46, %v343_v47  ;;  %v5011_v52 = vld [vmem:[%s6612_s1 + $0x150] ss:$8 sps:$4 sm:$0xff]   ;;  %v5019_v54 = vld [vmem:[%s6612_s1 + $0x164] ss:$8 sps:$4 sm:$0xff]  }
  0x3f   : > { %2606 = vmatpush1.bf16.msra.mxu1 %v4961_v56  ;;  %v5017_v56 = vld [vmem:[%s6612_s1 + $0x160] ss:$8 sps:$4 sm:$0xff]  }
  0x40   : > { %2945 = vmatpush1.bf16.msra.mxu0 %v4962_v57  ;;  %2607 = vmatprep.subr.bf16.mxu1 %v4963_v58  ;;  %v348_v57 = vld [vmem:[%s5575_s23 + $0x200] sm:$0xff] }
  0x41   : > { %2946 = vmatprep.subr.bf16.mxu0 %v4965_v59  ;;  %v356_v58 = vld [vmem:[%s5575_s23 + $0x240] sm:$0xff]  ;;  %v4105_v59 = vcombine.low %v332_v42, %v340_v43 }
  0x42   : > { %v4121_v10 = vcombine.low %v348_v57, %v356_v58  ;;  %v396_v42 = vld [vmem:[%s5575_s23 + $0x380] sm:$0xff] }
  0x43   : > { %2608 = vmatpush1.bf16.msra.mxu1 %v4967_v60  ;;  %v4111_v60 = vcombine.low %v335_v46, %v343_v47  ;;  %v404_v43 = vld [vmem:[%s5575_s23 + $0x3c0] sm:$0xff]  ;;  %v399_v46 = vld [vmem:[%s5575_s23 + $0x398] sm:$0xff] }
  0x44   : > { %2947 = vmatpush1.bf16.msra.mxu0 %v4968_v61  ;;  %2609 = vmatprep.subr.bf16.mxu1 %v4969_v62  ;;  %v351_v61 = vld [vmem:[%s5575_s23 + $0x218] sm:$0xff] }
  0x45   : > { %2948 = vmatprep.subr.bf16.mxu0 %v4971_v63  ;;  %v359_v62 = vld [vmem:[%s5575_s23 + $0x258] sm:$0xff]  ;;  %v5020_v63 = vld [vmem:[%s6612_s1 + $0x460] ss:$8 sps:$4 sm:$0xff]  }
  0x46   : > { %v407_v47 = vld [vmem:[%s5575_s23 + $0x3d8] sm:$0xff] }
  0x47   : > { %2610 = vmatpush1.bf16.msra.mxu1 %v4973_v0  ;;  %v5025_v0 = vld [vmem:[%s6612_s1 + $0x174] ss:$8 sps:$4 sm:$0xff]  }
  0x48   : > { %2949 = vmatpush1.bf16.msra.mxu0 %v4974_v1  ;;  %2611 = vmatprep.subr.bf16.mxu1 %v4975_v2  ;;  %v5028_v1 = vld [vmem:[%s6612_s1 + $0x474] ss:$8 sps:$4 sm:$0xff]   ;;  %v4122_v2 = vcombine.high %v348_v57, %v356_v58  ;;  %v5068_v57 = vld [vmem:[%s6612_s1 + $0x4e0] ss:$8 sps:$4 sm:$0xff]  }
  0x49   : > { %2950 = vmatprep.subr.bf16.mxu0 %v4977_v3  ;;  %v4128_v3 = vcombine.high %v351_v61, %v359_v62  ;;  %v285_v58 = vld [vmem:[%s5575_s23 + $0x8] sm:$0xff] }
  0x4b   : > { %2612 = vmatpush1.bf16.msra.mxu1 %v4979_v4  ;;  %v5023_v4 = vld [vmem:[%s6612_s1 + $0x170] ss:$8 sps:$4 sm:$0xff]  }
  0x4c   : > { %2951 = vmatpush1.bf16.msra.mxu0 %v4980_v5  ;;  %2694 = vmatprep.subr.bf16.mxu1 %v4983_v6  ;;  %v5026_v5 = vld [vmem:[%s6612_s1 + $0x470] ss:$8 sps:$4 sm:$0xff]   ;;  %v5031_v6 = vld [vmem:[%s6612_s1 + $0x184] ss:$8 sps:$4 sm:$0xff]  }
  0x4d   : > { %3033 = vmatprep.subr.bf16.mxu0 %v4986_v7  ;;  %v5034_v7 = vld [vmem:[%s6612_s1 + $0x484] ss:$8 sps:$4 sm:$0xff]  }
  0x4e   : > { %2614 = vmatmul.mubr.bf16.vlgmr.msra.gmra.mrb[0].mxu1 %v4057_v11  ;;  %v4127_v11 = vcombine.low %v351_v61, %v359_v62  ;;  %v4175_v61 = vcombine.low %v399_v46, %v407_v47  ;;  %v288_v62 = vld [vmem:[%s5575_s23 + $0x20] sm:$0xff] }
  0x4f   : > { %2953 = vmatmul.mubr.bf16.vlgmr.msra.gmra.mrb[0].mxu0 %v4063_v12  ;;  %2695 = vmatpush1.bf16.msra.mxu1 %v4981_v8  ;;  %v364_v8 = vld [vmem:[%s5575_s23 + $0x280] sm:$0xff]  ;;  %v367_v12 = vld [vmem:[%s5575_s23 + $0x298] sm:$0xff] }
  0x50   : > { %3034 = vmatpush1.bf16.msra.mxu0 %v4984_v9  ;;  %2696 = vmatprep.subr.bf16.mxu1 %v4989_v16  ;;  %v372_v9 = vld [vmem:[%s5575_s23 + $0x2c0] sm:$0xff]  ;;  %v5037_v16 = vld [vmem:[%s6612_s1 + $0x194] ss:$8 sps:$4 sm:$0xff]  }
  0x51   : > { %3035 = vmatprep.subr.bf16.mxu0 %v4992_v17  ;;  %2623 = vmatprep.mubr.bf16.mxu1 %v4074_v18  ;;  %v5040_v17 = vld [vmem:[%s6612_s1 + $0x494] ss:$8 sps:$4 sm:$0xff]   ;;  %v4138_v18 = vcombine.high %v364_v8, %v372_v9  ;;  %v4137_v27 = vcombine.low %v364_v8, %v372_v9  ;;  %v5077_v8 = vld [vmem:[%s6612_s1 + $0x200] ss:$8 sps:$4 sm:$0xff]  }
  0x52   : > { %2962 = vmatprep.mubr.bf16.mxu0 %v4080_v19  ;;  %v4144_v19 = vcombine.high %v367_v12, %v375_v13  ;;  %v301_v9 = vld [vmem:[%s5575_s23 + $0x88] sm:$0xff] }
  0x53   : > { %2697 = vmatpush1.bf16.msra.mxu1 %v4987_v20  ;;  %v5035_v20 = vld [vmem:[%s6612_s1 + $0x190] ss:$8 sps:$4 sm:$0xff]  }
  0x54   : > { %3036 = vmatpush1.bf16.msra.mxu0 %v4990_v21  ;;  %2698 = vmatprep.subr.bf16.mxu1 %v4995_v22  ;;  %v5038_v21 = vld [vmem:[%s6612_s1 + $0x490] ss:$8 sps:$4 sm:$0xff]   ;;  %v5043_v22 = vld [vmem:[%s6612_s1 + $0x1a4] ss:$8 sps:$4 sm:$0xff]  }
  0x55   : > { %3037 = vmatprep.subr.bf16.mxu0 %v4998_v23  ;;  %v5046_v23 = vld [vmem:[%s6612_s1 + $0x4a4] ss:$8 sps:$4 sm:$0xff]  }
  0x56   : > { %2624 = vmatmul.mubr.bf16.gmra.mrb[4].mxu1 %v4073_v28  ;;  %v4143_v28 = vcombine.low %v367_v12, %v375_v13  ;;  %v304_v13 = vld [vmem:[%s5575_s23 + $0xa0] sm:$0xff] }
  0x57   : > { %2963 = vmatmul.mubr.bf16.gmra.mrb[4].mxu0 %v4079_v29  ;;  %2699 = vmatpush1.bf16.msra.mxu1 %v4993_v24  ;;  %v5041_v24 = vld [vmem:[%s6612_s1 + $0x1a0] ss:$8 sps:$4 sm:$0xff]  }
  0x58   : > { %3038 = vmatpush1.bf16.msra.mxu0 %v4996_v25  ;;  %2700 = vmatprep.subr.bf16.mxu1 %v5001_v32  ;;  %v5044_v25 = vld [vmem:[%s6612_s1 + $0x4a0] ss:$8 sps:$4 sm:$0xff]   ;;  %v5049_v32 = vld [vmem:[%s6612_s1 + $0x1b4] ss:$8 sps:$4 sm:$0xff]  }
  0x59   : > { %3039 = vmatprep.subr.bf16.mxu0 %v5004_v33  ;;  %2633 = vmatprep.mubr.bf16.mxu1 %v4090_v34  ;;  %v388_v29 = vld [vmem:[%s5575_s23 + $0x340] sm:$0xff]  ;;  %v5052_v33 = vld [vmem:[%s6612_s1 + $0x4b4] ss:$8 sps:$4 sm:$0xff]  }
  0x5a   : > { %2972 = vmatprep.mubr.bf16.mxu0 %v4096_v35  ;;  %v4154_v34 = vcombine.high %v380_v26, %v388_v29  ;;  %v4160_v35 = vcombine.high %v383_v30, %v391_v31 }
  0x5b   : > { %2701 = vmatpush1.bf16.msra.mxu1 %v4999_v36  ;;  %v5047_v36 = vld [vmem:[%s6612_s1 + $0x1b0] ss:$8 sps:$4 sm:$0xff]  }
  0x5c   : > { %3040 = vmatpush1.bf16.msra.mxu0 %v5002_v37  ;;  %2702 = vmatprep.subr.bf16.mxu1 %v5007_v38  ;;  %v5050_v37 = vld [vmem:[%s6612_s1 + $0x4b0] ss:$8 sps:$4 sm:$0xff]   ;;  %v5055_v38 = vld [vmem:[%s6612_s1 + $0x1c4] ss:$8 sps:$4 sm:$0xff]  }
  0x5d   : > { %3041 = vmatprep.subr.bf16.mxu0 %v5010_v39  ;;  %v5058_v39 = vld [vmem:[%s6612_s1 + $0x4c4] ss:$8 sps:$4 sm:$0xff]  }
  0x5e   : > { %2634 = vmatmul.mubr.bf16.gmra.mrb[8].mxu1 %v4089_v44  ;;  %v4153_v44 = vcombine.low %v380_v26, %v388_v29  ;;  %v328_v29 = vld [vmem:[%s5575_s23 + $0x160] sm:$0xff] }
  0x5f   : > { %2973 = vmatmul.mubr.bf16.gmra.mrb[8].mxu0 %v4095_v45  ;;  %2703 = vmatpush1.bf16.msra.mxu1 %v5005_v40  ;;  %v5053_v40 = vld [vmem:[%s6612_s1 + $0x1c0] ss:$8 sps:$4 sm:$0xff]   ;;  %v4159_v45 = vcombine.low %v383_v30, %v391_v31 }
  0x60   : > { %3042 = vmatpush1.bf16.msra.mxu0 %v5008_v41  ;;  %2704 = vmatprep.subr.bf16.mxu1 %v5013_v48  ;;  %v5056_v41 = vld [vmem:[%s6612_s1 + $0x4c0] ss:$8 sps:$4 sm:$0xff]   ;;  %v5061_v48 = vld [vmem:[%s6612_s1 + $0x1d4] ss:$8 sps:$4 sm:$0xff]  }
  0x61   : > { %3043 = vmatprep.subr.bf16.mxu0 %v5016_v49  ;;  %2643 = vmatprep.mubr.bf16.mxu1 %v4106_v50  ;;  %v5064_v49 = vld [vmem:[%s6612_s1 + $0x4d4] ss:$8 sps:$4 sm:$0xff]   ;;  %v4170_v50 = vcombine.high %v396_v42, %v404_v43  ;;  %v5089_v30 = vld [vmem:[%s6612_s1 + $0x220] ss:$8 sps:$4 sm:$0xff]  }
  0x62   : > { %2982 = vmatprep.mubr.bf16.mxu0 %v4112_v51  ;;  %v4176_v51 = vcombine.high %v399_v46, %v407_v47  ;;  %v5092_v31 = vld [vmem:[%s6612_s1 + $0x520] ss:$8 sps:$4 sm:$0xff]  }
  0x63   : > { %2705 = vmatpush1.bf16.msra.mxu1 %v5011_v52  ;;  %v5059_v52 = vld [vmem:[%s6612_s1 + $0x1d0] ss:$8 sps:$4 sm:$0xff]   ;;  %v336_v46 = vld [vmem:[%s5575_s23 + $0x1a0] sm:$0xff] }
  0x64   : > { %3044 = vmatpush1.bf16.msra.mxu0 %v5014_v53  ;;  %2706 = vmatprep.subr.bf16.mxu1 %v5019_v54  ;;  %v5062_v53 = vld [vmem:[%s6612_s1 + $0x4d0] ss:$8 sps:$4 sm:$0xff]   ;;  %v5067_v54 = vld [vmem:[%s6612_s1 + $0x1e4] ss:$8 sps:$4 sm:$0xff]  }
  0x65   : > { %3045 = vmatprep.subr.bf16.mxu0 %v5022_v55  ;;  %v5070_v55 = vld [vmem:[%s6612_s1 + $0x4e4] ss:$8 sps:$4 sm:$0xff]  }
  0x66   : > { %2644 = vmatmul.mubr.bf16.gmra.mrb[12].mxu1 %v4105_v59  ;;  %v293_v59 = vld [vmem:[%s5575_s23 + $0x48] sm:$0xff]  ;;  %v344_v47 = vld [vmem:[%s5575_s23 + $0x1e0] sm:$0xff] }
  0x67   : > { %2983 = vmatmul.mubr.bf16.gmra.mrb[12].mxu0 %v4111_v60  ;;  %2707 = vmatpush1.bf16.msra.mxu1 %v5017_v56  ;;  %v5065_v56 = vld [vmem:[%s6612_s1 + $0x1e0] ss:$8 sps:$4 sm:$0xff]   ;;  %v4169_v60 = vcombine.low %v396_v42, %v404_v43 }
  0x68   : > { %3046 = vmatpush1.bf16.msra.mxu0 %v5020_v63  ;;  %2708 = vmatprep.subr.bf16.mxu1 %v5025_v0  ;;  %v296_v63 = vld [vmem:[%s5575_s23 + $0x60] sm:$0xff]  ;;  %v5073_v0 = vld [vmem:[%s6612_s1 + $0x1f4] ss:$8 sps:$4 sm:$0xff]   ;;  %v333_v42 = vld [vmem:[%s5575_s23 + $0x188] sm:$0xff] }
  0x69   : > { %3047 = vmatprep.subr.bf16.mxu0 %v5028_v1  ;;  %2653 = vmatprep.mubr.bf16.mxu1 %v4122_v2  ;;  %v5076_v1 = vld [vmem:[%s6612_s1 + $0x4f4] ss:$8 sps:$4 sm:$0xff]   ;;  %v4060_v2 = vcombine.high %v285_v58, %v293_v59  ;;  %v4065_v12 = vcombine.low %v288_v62, %v296_v63 }
  0x6a   : > { %2992 = vmatprep.mubr.bf16.mxu0 %v4128_v3  ;;  %v4066_v3 = vcombine.high %v288_v62, %v296_v63  ;;  %v360_v62 = vld [vmem:[%s5575_s23 + $0x260] sm:$0xff] }
  0x6b   : > { %2709 = vmatpush1.bf16.msra.mxu1 %v5023_v4  ;;  %v5071_v4 = vld [vmem:[%s6612_s1 + $0x1f0] ss:$8 sps:$4 sm:$0xff]   ;;  %v5116_v63 = vld [vmem:[%s6612_s1 + $0x560] ss:$8 sps:$4 sm:$0xff]  }
  0x6c   : > { %3048 = vmatpush1.bf16.msra.mxu0 %v5026_v5  ;;  %2710 = vmatprep.subr.bf16.mxu1 %v5031_v6  ;;  %v5074_v5 = vld [vmem:[%s6612_s1 + $0x4f0] ss:$8 sps:$4 sm:$0xff]   ;;  %v5079_v6 = vld [vmem:[%s6612_s1 + $0x204] ss:$8 sps:$4 sm:$0xff]  }
  0x6d   : > { %3049 = vmatprep.subr.bf16.mxu0 %v5034_v7  ;;  %v5082_v7 = vld [vmem:[%s6612_s1 + $0x504] ss:$8 sps:$4 sm:$0xff]  }
  0x6e   : > { %2654 = vmatmul.mubr.bf16.gmra.mrb[16].mxu1 %v4121_v10  ;;  %v309_v10 = vld [vmem:[%s5575_s23 + $0xc8] sm:$0xff] }
  0x6f   : > { %2993 = vmatmul.mubr.bf16.gmra.mrb[16].mxu0 %v4127_v11  ;;  %2711 = vmatpush1.bf16.msra.mxu1 %v5029_v14  ;;  %v4059_v11 = vcombine.low %v285_v58, %v293_v59  ;;  %v312_v14 = vld [vmem:[%s5575_s23 + $0xe0] sm:$0xff]  ;;  %v4075_v26 = vcombine.low %v301_v9, %v309_v10  ;;  %v357_v58 = vld [vmem:[%s5575_s23 + $0x248] sm:$0xff] }
  0x70   : > { %3050 = vmatpush1.bf16.msra.mxu0 %v5032_v15  ;;  %2712 = vmatprep.subr.bf16.mxu1 %v5037_v16  ;;  %v5080_v15 = vld [vmem:[%s6612_s1 + $0x500] ss:$8 sps:$4 sm:$0xff]   ;;  %v5085_v16 = vld [vmem:[%s6612_s1 + $0x214] ss:$8 sps:$4 sm:$0xff]  }
  0x71   : > { %3051 = vmatprep.subr.bf16.mxu0 %v5040_v17  ;;  %2663 = vmatprep.mubr.bf16.mxu1 %v4138_v18  ;;  %v5088_v17 = vld [vmem:[%s6612_s1 + $0x514] ss:$8 sps:$4 sm:$0xff]   ;;  %v4076_v18 = vcombine.high %v301_v9, %v309_v10  ;;  %v365_v9 = vld [vmem:[%s5575_s23 + $0x288] sm:$0xff] }
  0x72   : > { %3002 = vmatprep.mubr.bf16.mxu0 %v4144_v19  ;;  %v4082_v19 = vcombine.high %v304_v13, %v312_v14  ;;  %v373_v10 = vld [vmem:[%s5575_s23 + $0x2c8] sm:$0xff] }
  0x73   : > { %2713 = vmatpush1.bf16.msra.mxu1 %v5035_v20  ;;  %v5083_v20 = vld [vmem:[%s6612_s1 + $0x210] ss:$8 sps:$4 sm:$0xff]  }
  0x74   : > { %3052 = vmatpush1.bf16.msra.mxu0 %v5038_v21  ;;  %2714 = vmatprep.subr.bf16.mxu1 %v5043_v22  ;;  %v5086_v21 = vld [vmem:[%s6612_s1 + $0x510] ss:$8 sps:$4 sm:$0xff]   ;;  %v5091_v22 = vld [vmem:[%s6612_s1 + $0x224] ss:$8 sps:$4 sm:$0xff]  }
  0x75   : > { %3053 = vmatprep.subr.bf16.mxu0 %v5046_v23  ;;  %v5094_v23 = vld [vmem:[%s6612_s1 + $0x524] ss:$8 sps:$4 sm:$0xff]  }
  0x76   : > { %2664 = vmatmul.mubr.bf16.gmra.mrb[20].mxu1 %v4137_v27  ;;  %v4081_v27 = vcombine.low %v304_v13, %v312_v14  ;;  %v368_v13 = vld [vmem:[%s5575_s23 + $0x2a0] sm:$0xff] }
  0x77   : > { %3003 = vmatmul.mubr.bf16.gmra.mrb[20].mxu0 %v4143_v28  ;;  %2715 = vmatpush1.bf16.msra.mxu1 %v5041_v24  ;;  %v317_v24 = vld [vmem:[%s5575_s23 + $0x108] sm:$0xff]  ;;  %v320_v28 = vld [vmem:[%s5575_s23 + $0x120] sm:$0xff] }
  0x78   : > { %3054 = vmatpush1.bf16.msra.mxu0 %v5044_v25  ;;  %2716 = vmatprep.subr.bf16.mxu1 %v5049_v32  ;;  %v325_v25 = vld [vmem:[%s5575_s23 + $0x148] sm:$0xff]  ;;  %v5097_v32 = vld [vmem:[%s6612_s1 + $0x234] ss:$8 sps:$4 sm:$0xff]   ;;  %v376_v14 = vld [vmem:[%s5575_s23 + $0x2e0] sm:$0xff] }
  0x79   : > { %3055 = vmatprep.subr.bf16.mxu0 %v5052_v33  ;;  %2673 = vmatprep.mubr.bf16.mxu1 %v4154_v34  ;;  %v5100_v33 = vld [vmem:[%s6612_s1 + $0x534] ss:$8 sps:$4 sm:$0xff]   ;;  %v4092_v34 = vcombine.high %v317_v24, %v325_v25  ;;  %v4091_v43 = vcombine.low %v317_v24, %v325_v25  ;;  %v5137_v24 = vld [vmem:[%s6612_s1 + $0x2a0] ss:$8 sps:$4 sm:$0xff]  }
  0x7a   : > { %3012 = vmatprep.mubr.bf16.mxu0 %v4160_v35  ;;  %v4098_v35 = vcombine.high %v320_v28, %v328_v29  ;;  %v381_v25 = vld [vmem:[%s5575_s23 + $0x308] sm:$0xff] }
  0x7b   : > { %2717 = vmatpush1.bf16.msra.mxu1 %v5047_v36  ;;  %v5095_v36 = vld [vmem:[%s6612_s1 + $0x230] ss:$8 sps:$4 sm:$0xff]  }
  0x7c   : > { %3056 = vmatpush1.bf16.msra.mxu0 %v5050_v37  ;;  %2718 = vmatprep.subr.bf16.mxu1 %v5055_v38  ;;  %v5098_v37 = vld [vmem:[%s6612_s1 + $0x530] ss:$8 sps:$4 sm:$0xff]   ;;  %v5103_v38 = vld [vmem:[%s6612_s1 + $0x244] ss:$8 sps:$4 sm:$0xff]  }
  0x7d   : > { %3057 = vmatprep.subr.bf16.mxu0 %v5058_v39  ;;  %v5106_v39 = vld [vmem:[%s6612_s1 + $0x544] ss:$8 sps:$4 sm:$0xff]  }
  0x7e   : > { %2674 = vmatmul.mubr.bf16.gmra.mrb[24].mxu1 %v4153_v44  ;;  %v4097_v44 = vcombine.low %v320_v28, %v328_v29  ;;  %v4145_v28 = vcombine.low %v368_v13, %v376_v14  ;;  %v384_v29 = vld [vmem:[%s5575_s23 + $0x320] sm:$0xff] }
  0x7f   : > { %3013 = vmatmul.mubr.bf16.gmra.mrb[24].mxu0 %v4159_v45  ;;  %2719 = vmatpush1.bf16.msra.mxu1 %v5053_v40  ;;  %v5101_v40 = vld [vmem:[%s6612_s1 + $0x240] ss:$8 sps:$4 sm:$0xff]  }
  0x80   : > { %3058 = vmatpush1.bf16.msra.mxu0 %v5056_v41  ;;  %2720 = vmatprep.subr.bf16.mxu1 %v5061_v48  ;;  %v5104_v41 = vld [vmem:[%s6612_s1 + $0x540] ss:$8 sps:$4 sm:$0xff]   ;;  %v5109_v48 = vld [vmem:[%s6612_s1 + $0x254] ss:$8 sps:$4 sm:$0xff]  }
  0x81   : > { %3059 = vmatprep.subr.bf16.mxu0 %v5064_v49  ;;  %2683 = vmatprep.mubr.bf16.mxu1 %v4170_v50  ;;  %v341_v45 = vld [vmem:[%s5575_s23 + $0x1c8] sm:$0xff]  ;;  %v5112_v49 = vld [vmem:[%s6612_s1 + $0x554] ss:$8 sps:$4 sm:$0xff]  }
  0x82   : > { %3022 = vmatprep.mubr.bf16.mxu0 %v4176_v51  ;;  %v4108_v50 = vcombine.high %v333_v42, %v341_v45  ;;  %v4114_v51 = vcombine.high %v336_v46, %v344_v47  ;;  %v4107_v59 = vcombine.low %v333_v42, %v341_v45  ;;  %v405_v42 = vld [vmem:[%s5575_s23 + $0x3c8] sm:$0xff]  ;;  %v400_v45 = vld [vmem:[%s5575_s23 + $0x3a0] sm:$0xff] }
  0x83   : > { %2721 = vmatpush1.bf16.msra.mxu1 %v5059_v52  ;;  %v5107_v52 = vld [vmem:[%s6612_s1 + $0x250] ss:$8 sps:$4 sm:$0xff]  }
  0x84   : > { %3060 = vmatpush1.bf16.msra.mxu0 %v5062_v53  ;;  %2722 = vmatprep.subr.bf16.mxu1 %v5067_v54  ;;  %v5110_v53 = vld [vmem:[%s6612_s1 + $0x550] ss:$8 sps:$4 sm:$0xff]   ;;  %v5115_v54 = vld [vmem:[%s6612_s1 + $0x264] ss:$8 sps:$4 sm:$0xff]  }
  0x85   : > { %3061 = vmatprep.subr.bf16.mxu0 %v5070_v55  ;;  %v5118_v55 = vld [vmem:[%s6612_s1 + $0x564] ss:$8 sps:$4 sm:$0xff]  }
  0x86   : > { %2684 = vmatmul.mubr.bf16.gmra.mrb[28].mxu1 %v4169_v60  ;;  %v4113_v60 = vcombine.low %v336_v46, %v344_v47  ;;  %v408_v46 = vld [vmem:[%s5575_s23 + $0x3e0] sm:$0xff] }
  0x87   : > { %3023 = vmatmul.mubr.bf16.gmra.mrb[28].mxu0 %v4175_v61  ;;  %2723 = vmatpush1.bf16.msra.mxu1 %v5065_v56  ;;  %v5113_v56 = vld [vmem:[%s6612_s1 + $0x260] ss:$8 sps:$4 sm:$0xff]  }
  0x88   : > { %3062 = vmatpush1.bf16.msra.mxu0 %v5068_v57  ;;  %2724 = vmatprep.subr.bf16.mxu1 %v5073_v0  ;;  %v349_v57 = vld [vmem:[%s5575_s23 + $0x208] sm:$0xff]  ;;  %v352_v61 = vld [vmem:[%s5575_s23 + $0x220] sm:$0xff]  ;;  %v5121_v0 = vld [vmem:[%s6612_s1 + $0x274] ss:$8 sps:$4 sm:$0xff]  }
  0x89   : > { %3063 = vmatprep.subr.bf16.mxu0 %v5076_v1  ;;  %2726 = vmatprep.mubr.bf16.mxu1 %v4060_v2  ;;  %v5124_v1 = vld [vmem:[%s6612_s1 + $0x574] ss:$8 sps:$4 sm:$0xff]   ;;  %v4124_v2 = vcombine.high %v349_v57, %v357_v58  ;;  %v5152_v47 = vld [vmem:[%s6612_s1 + $0x5c0] ss:$8 sps:$4 sm:$0xff]  }
  0x8a   : > { %3065 = vmatprep.mubr.bf16.mxu0 %v4066_v3  ;;  %v4130_v3 = vcombine.high %v352_v61, %v360_v62 }
  0x8b   : > { %2725 = vmatpush1.bf16.msra.mxu1 %v5071_v4  ;;  %v5119_v4 = vld [vmem:[%s6612_s1 + $0x270] ss:$8 sps:$4 sm:$0xff]  }
  0x8c   : > { %3064 = vmatpush1.bf16.msra.mxu0 %v5074_v5  ;;  %2807 = vmatprep.subr.bf16.mxu1 %v5079_v6  ;;  %v5122_v5 = vld [vmem:[%s6612_s1 + $0x570] ss:$8 sps:$4 sm:$0xff]   ;;  %v5127_v6 = vld [vmem:[%s6612_s1 + $0x284] ss:$8 sps:$4 sm:$0xff]  }
  0x8d   : > { %3146 = vmatprep.subr.bf16.mxu0 %v5082_v7  ;;  %v5130_v7 = vld [vmem:[%s6612_s1 + $0x584] ss:$8 sps:$4 sm:$0xff]  }
  0x8e   : > { %2727 = vmatmul.mubr.bf16.vlgmr.msra.gmra.mrb[0].mxu1 %v4059_v11  ;;  %v4123_v11 = vcombine.low %v349_v57, %v357_v58  ;;  %v294_v57 = vld [vmem:[%s5575_s23 + $0x50] sm:$0xff]  ;;  %v289_v58 = vld [vmem:[%s5575_s23 + $0x28] sm:$0xff] }
  0x8f   : > { %3066 = vmatmul.mubr.bf16.vlgmr.msra.gmra.mrb[0].mxu0 %v4065_v12  ;;  %2808 = vmatpush1.bf16.msra.mxu1 %v5077_v8  ;;  %v5125_v8 = vld [vmem:[%s6612_s1 + $0x280] ss:$8 sps:$4 sm:$0xff]   ;;  %v4129_v12 = vcombine.low %v352_v61, %v360_v62 }
  0x90   : > { %3147 = vmatpush1.bf16.msra.mxu0 %v5080_v15  ;;  %2809 = vmatprep.subr.bf16.mxu1 %v5085_v16  ;;  %v5128_v15 = vld [vmem:[%s6612_s1 + $0x580] ss:$8 sps:$4 sm:$0xff]   ;;  %v5133_v16 = vld [vmem:[%s6612_s1 + $0x294] ss:$8 sps:$4 sm:$0xff]  }
  0x91   : > { %3148 = vmatprep.subr.bf16.mxu0 %v5088_v17  ;;  %2736 = vmatprep.mubr.bf16.mxu1 %v4076_v18  ;;  %v5136_v17 = vld [vmem:[%s6612_s1 + $0x594] ss:$8 sps:$4 sm:$0xff]   ;;  %v4140_v18 = vcombine.high %v365_v9, %v373_v10  ;;  %v297_v61 = vld [vmem:[%s5575_s23 + $0x68] sm:$0xff] }
  0x92   : > { %3075 = vmatprep.mubr.bf16.mxu0 %v4082_v19  ;;  %v4146_v19 = vcombine.high %v368_v13, %v376_v14  ;;  %v5161_v62 = vld [vmem:[%s6612_s1 + $0x2e0] ss:$8 sps:$4 sm:$0xff]  }
  0x93   : > { %2810 = vmatpush1.bf16.msra.mxu1 %v5083_v20  ;;  %v5131_v20 = vld [vmem:[%s6612_s1 + $0x290] ss:$8 sps:$4 sm:$0xff]   ;;  %v5173_v13 = vld [vmem:[%s6612_s1 + $0x600] ss:$8 sps:$4 sm:$0xff]  }
  0x94   : > { %3149 = vmatpush1.bf16.msra.mxu0 %v5086_v21  ;;  %2811 = vmatprep.subr.bf16.mxu1 %v5091_v22  ;;  %v5134_v21 = vld [vmem:[%s6612_s1 + $0x590] ss:$8 sps:$4 sm:$0xff]   ;;  %v5139_v22 = vld [vmem:[%s6612_s1 + $0x2a4] ss:$8 sps:$4 sm:$0xff]  }
  0x95   : > { %3150 = vmatprep.subr.bf16.mxu0 %v5094_v23  ;;  %v5142_v23 = vld [vmem:[%s6612_s1 + $0x5a4] ss:$8 sps:$4 sm:$0xff]  }
  0x96   : > { %2737 = vmatmul.mubr.bf16.gmra.mrb[4].mxu1 %v4075_v26  ;;  %v389_v26 = vld [vmem:[%s5575_s23 + $0x348] sm:$0xff] }
  0x97   : > { %3076 = vmatmul.mubr.bf16.gmra.mrb[4].mxu0 %v4081_v27  ;;  %2812 = vmatpush1.bf16.msra.mxu1 %v5089_v30  ;;  %v4139_v27 = vcombine.low %v365_v9, %v373_v10  ;;  %v392_v30 = vld [vmem:[%s5575_s23 + $0x360] sm:$0xff]  ;;  %v305_v9 = vld [vmem:[%s5575_s23 + $0xa8] sm:$0xff] }
  0x98   : > { %3151 = vmatpush1.bf16.msra.mxu0 %v5092_v31  ;;  %2813 = vmatprep.subr.bf16.mxu1 %v5097_v32  ;;  %v5140_v31 = vld [vmem:[%s6612_s1 + $0x5a0] ss:$8 sps:$4 sm:$0xff]   ;;  %v5145_v32 = vld [vmem:[%s6612_s1 + $0x2b4] ss:$8 sps:$4 sm:$0xff]  }
  0x99   : > { %3152 = vmatprep.subr.bf16.mxu0 %v5100_v33  ;;  %2746 = vmatprep.mubr.bf16.mxu1 %v4092_v34  ;;  %v5148_v33 = vld [vmem:[%s6612_s1 + $0x5b4] ss:$8 sps:$4 sm:$0xff]   ;;  %v4156_v34 = vcombine.high %v381_v25, %v389_v26  ;;  %v313_v10 = vld [vmem:[%s5575_s23 + $0xe8] sm:$0xff] }
  0x9a   : > { %3085 = vmatprep.mubr.bf16.mxu0 %v4098_v35  ;;  %v4162_v35 = vcombine.high %v384_v29, %v392_v30 }
  0x9b   : > { %2814 = vmatpush1.bf16.msra.mxu1 %v5095_v36  ;;  %v5143_v36 = vld [vmem:[%s6612_s1 + $0x2b0] ss:$8 sps:$4 sm:$0xff]  }
  0x9c   : > { %3153 = vmatpush1.bf16.msra.mxu0 %v5098_v37  ;;  %2815 = vmatprep.subr.bf16.mxu1 %v5103_v38  ;;  %v5146_v37 = vld [vmem:[%s6612_s1 + $0x5b0] ss:$8 sps:$4 sm:$0xff]   ;;  %v5151_v38 = vld [vmem:[%s6612_s1 + $0x2c4] ss:$8 sps:$4 sm:$0xff]  }
  0x9d   : > { %3154 = vmatprep.subr.bf16.mxu0 %v5106_v39  ;;  %v5154_v39 = vld [vmem:[%s6612_s1 + $0x5c4] ss:$8 sps:$4 sm:$0xff]  }
  0x9e   : > { %2747 = vmatmul.mubr.bf16.gmra.mrb[8].mxu1 %v4091_v43  ;;  %v4155_v43 = vcombine.low %v381_v25, %v389_v26  ;;  %v5179_v25 = vld [vmem:[%s6612_s1 + $0x620] ss:$8 sps:$4 sm:$0xff]  }
  0x9f   : > { %3086 = vmatmul.mubr.bf16.gmra.mrb[8].mxu0 %v4097_v44  ;;  %2816 = vmatpush1.bf16.msra.mxu1 %v5101_v40  ;;  %v5149_v40 = vld [vmem:[%s6612_s1 + $0x2c0] ss:$8 sps:$4 sm:$0xff]   ;;  %v4161_v44 = vcombine.low %v384_v29, %v392_v30  ;;  %v5182_v29 = vld [vmem:[%s6612_s1 + $0x630] ss:$8 sps:$4 sm:$0xff]   ;;  %v5187_v30 = vld [vmem:[%s6612_s1 + $0x644] ss:$8 sps:$4 sm:$0xff]  }
  0xa0   : > { %3155 = vmatpush1.bf16.msra.mxu0 %v5104_v41  ;;  %2817 = vmatprep.subr.bf16.mxu1 %v5109_v48  ;;  %v397_v41 = vld [vmem:[%s5575_s23 + $0x388] sm:$0xff]  ;;  %v5157_v48 = vld [vmem:[%s6612_s1 + $0x2d4] ss:$8 sps:$4 sm:$0xff]  }
  0xa1   : > { %3156 = vmatprep.subr.bf16.mxu0 %v5112_v49  ;;  %2756 = vmatprep.mubr.bf16.mxu1 %v4108_v50  ;;  %v5160_v49 = vld [vmem:[%s6612_s1 + $0x5d4] ss:$8 sps:$4 sm:$0xff]   ;;  %v4172_v50 = vcombine.high %v397_v41, %v405_v42 }
  0xa2   : > { %3095 = vmatprep.mubr.bf16.mxu0 %v4114_v51  ;;  %v4178_v51 = vcombine.high %v400_v45, %v408_v46 }
  0xa3   : > { %2818 = vmatpush1.bf16.msra.mxu1 %v5107_v52  ;;  %v5155_v52 = vld [vmem:[%s6612_s1 + $0x2d0] ss:$8 sps:$4 sm:$0xff]  }
  0xa4   : > { %3157 = vmatpush1.bf16.msra.mxu0 %v5110_v53  ;;  %2819 = vmatprep.subr.bf16.mxu1 %v5115_v54  ;;  %v5158_v53 = vld [vmem:[%s6612_s1 + $0x5d0] ss:$8 sps:$4 sm:$0xff]   ;;  %v5163_v54 = vld [vmem:[%s6612_s1 + $0x2e4] ss:$8 sps:$4 sm:$0xff]  }
  0xa5   : > { %3158 = vmatprep.subr.bf16.mxu0 %v5118_v55  ;;  %v5166_v55 = vld [vmem:[%s6612_s1 + $0x5e4] ss:$8 sps:$4 sm:$0xff]  }
  0xa6   : > { %2757 = vmatmul.mubr.bf16.gmra.mrb[12].mxu1 %v4107_v59  ;;  %v4171_v59 = vcombine.low %v397_v41, %v405_v42  ;;  %v5188_v41 = vld [vmem:[%s6612_s1 + $0x650] ss:$8 sps:$4 sm:$0xff]   ;;  %v5193_v42 = vld [vmem:[%s6612_s1 + $0x664] ss:$8 sps:$4 sm:$0xff]  }
  0xa7   : > { %3096 = vmatmul.mubr.bf16.gmra.mrb[12].mxu0 %v4113_v60  ;;  %2820 = vmatpush1.bf16.msra.mxu1 %v5113_v56  ;;  %v286_v56 = vld [vmem:[%s5575_s23 + $0x10] sm:$0xff]  ;;  %v4177_v60 = vcombine.low %v400_v45, %v408_v46  ;;  %v353_v45 = vld [vmem:[%s5575_s23 + $0x228] sm:$0xff] }
  0xa8   : > { %3159 = vmatpush1.bf16.msra.mxu0 %v5116_v63  ;;  %2821 = vmatprep.subr.bf16.mxu1 %v5121_v0  ;;  %v5164_v63 = vld [vmem:[%s6612_s1 + $0x5e0] ss:$8 sps:$4 sm:$0xff]   ;;  %v5169_v0 = vld [vmem:[%s6612_s1 + $0x2f4] ss:$8 sps:$4 sm:$0xff]  }
  0xa9   : > { %3160 = vmatprep.subr.bf16.mxu0 %v5124_v1  ;;  %2766 = vmatprep.mubr.bf16.mxu1 %v4124_v2  ;;  %v5172_v1 = vld [vmem:[%s6612_s1 + $0x5f4] ss:$8 sps:$4 sm:$0xff]   ;;  %v4062_v2 = vcombine.high %v286_v56, %v294_v57  ;;  %v361_v46 = vld [vmem:[%s5575_s23 + $0x268] sm:$0xff] }
  0xaa   : > { %3105 = vmatprep.mubr.bf16.mxu0 %v4130_v3  ;;  %v4068_v3 = vcombine.high %v289_v58, %v297_v61 }
  0xab   : > { %2822 = vmatpush1.bf16.msra.mxu1 %v5119_v4  ;;  %v5167_v4 = vld [vmem:[%s6612_s1 + $0x2f0] ss:$8 sps:$4 sm:$0xff]  }
  0xac   : > { %3161 = vmatpush1.bf16.msra.mxu0 %v5122_v5  ;;  %2823 = vmatprep.subr.bf16.mxu1 %v5127_v6  ;;  %v5170_v5 = vld [vmem:[%s6612_s1 + $0x5f0] ss:$8 sps:$4 sm:$0xff]   ;;  %v5175_v6 = vld [vmem:[%s6612_s1 + $0x604] ss:$8 sps:$4 sm:$0xff]  }
  0xad   : > { %3162 = vmatprep.subr.bf16.mxu0 %v5130_v7  ;;  %v302_v7 = vld [vmem:[%s5575_s23 + $0x90] sm:$0xff] }
  0xae   : > { %2767 = vmatmul.mubr.bf16.gmra.mrb[16].mxu1 %v4123_v11  ;;  %v4061_v11 = vcombine.low %v286_v56, %v294_v57  ;;  %v374_v56 = vld [vmem:[%s5575_s23 + $0x2d0] sm:$0xff]  ;;  %v369_v57 = vld [vmem:[%s5575_s23 + $0x2a8] sm:$0xff] }
  0xaf   : > { %3106 = vmatmul.mubr.bf16.gmra.mrb[16].mxu0 %v4129_v12  ;;  %2824 = vmatpush1.bf16.msra.mxu1 %v5125_v8  ;;  %v310_v8 = vld [vmem:[%s5575_s23 + $0xd0] sm:$0xff]  ;;  %v4067_v12 = vcombine.low %v289_v58, %v297_v61  ;;  %v377_v58 = vld [vmem:[%s5575_s23 + $0x2e8] sm:$0xff] }
  0xb0   : > { %3163 = vmatpush1.bf16.msra.mxu0 %v5128_v15  ;;  %2825 = vmatprep.subr.bf16.mxu1 %v5133_v16  ;;  %v4078_v14 = vcombine.high %v302_v7, %v310_v8  ;;  %v5178_v15 = vld [vmem:[%s6612_s1 + $0x614] ss:$8 sps:$4 sm:$0xff]   ;;  %v4084_v16 = vcombine.high %v305_v9, %v313_v10  ;;  %v5197_v61 = vld [vmem:[%s6612_s1 + $0x680] ss:$8 sps:$4 sm:$0xff]  }
  0xb1   : > { %3164 = vmatprep.subr.bf16.mxu0 %v5136_v17  ;;  %2776 = vmatprep.mubr.bf16.mxu1 %v4140_v18  ;;  %v5176_v17 = vld [vmem:[%s6612_s1 + $0x610] ss:$8 sps:$4 sm:$0xff]   ;;  %v5181_v18 = vld [vmem:[%s6612_s1 + $0x624] ss:$8 sps:$4 sm:$0xff]  }
  0xb2   : > { %3115 = vmatprep.mubr.bf16.mxu0 %v4146_v19  ;;  %v318_v19 = vld [vmem:[%s5575_s23 + $0x110] sm:$0xff] }
  0xb3   : > { %2826 = vmatpush1.bf16.msra.mxu1 %v5131_v20  ;;  %v326_v20 = vld [vmem:[%s5575_s23 + $0x150] sm:$0xff] }
  0xb4   : > { %3165 = vmatpush1.bf16.msra.mxu0 %v5134_v21  ;;  %2827 = vmatprep.subr.bf16.mxu1 %v5139_v22  ;;  %v321_v21 = vld [vmem:[%s5575_s23 + $0x128] sm:$0xff]  ;;  %v4094_v26 = vcombine.high %v318_v19, %v326_v20 }
  0xb5   : > { %3166 = vmatprep.subr.bf16.mxu0 %v5142_v23  ;;  %v329_v22 = vld [vmem:[%s5575_s23 + $0x168] sm:$0xff]  ;;  %v4077_v23 = vcombine.low %v302_v7, %v310_v8  ;;  %v4147_v8 = vcombine.low %v369_v57, %v377_v58 }
  0xb6   : > { %2777 = vmatmul.mubr.bf16.gmra.mrb[20].mxu1 %v4139_v27  ;;  %v5184_v27 = vld [vmem:[%s6612_s1 + $0x634] ss:$8 sps:$4 sm:$0xff]  }
  0xb7   : > { %3116 = vmatmul.mubr.bf16.gmra.mrb[20].mxu0 %v4145_v28  ;;  %2828 = vmatpush1.bf16.msra.mxu1 %v5137_v24  ;;  %v4083_v24 = vcombine.low %v305_v9, %v313_v10  ;;  %v4100_v28 = vcombine.high %v321_v21, %v329_v22  ;;  %v5203_v9 = vld [vmem:[%s6612_s1 + $0x6a0] ss:$8 sps:$4 sm:$0xff]  }
  0xb8   : > { %3167 = vmatpush1.bf16.msra.mxu0 %v5140_v31  ;;  %2829 = vmatprep.subr.bf16.mxu1 %v5145_v32  ;;  %v334_v31 = vld [vmem:[%s5575_s23 + $0x190] sm:$0xff] }
  0xb9   : > { %3168 = vmatprep.subr.bf16.mxu0 %v5148_v33  ;;  %2786 = vmatprep.mubr.bf16.mxu1 %v4156_v34  ;;  %v342_v32 = vld [vmem:[%s5575_s23 + $0x1d0] sm:$0xff]  ;;  %v337_v33 = vld [vmem:[%s5575_s23 + $0x1a8] sm:$0xff] }
  0xba   : > { %3125 = vmatprep.mubr.bf16.mxu0 %v4162_v35  ;;  %v345_v34 = vld [vmem:[%s5575_s23 + $0x1e8] sm:$0xff] }
  0xbb   : > { %2830 = vmatpush1.bf16.msra.mxu1 %v5143_v36  ;;  %v5185_v35 = vld [vmem:[%s6612_s1 + $0x640] ss:$8 sps:$4 sm:$0xff]   ;;  %v4093_v36 = vcombine.low %v318_v19, %v326_v20 }
  0xbc   : > { %3169 = vmatpush1.bf16.msra.mxu0 %v5146_v37  ;;  %2831 = vmatprep.subr.bf16.mxu1 %v5151_v38  ;;  %v4099_v37 = vcombine.low %v321_v21, %v329_v22  ;;  %v5190_v38 = vld [vmem:[%s6612_s1 + $0x654] ss:$8 sps:$4 sm:$0xff]   ;;  %v5209_v21 = vld [vmem:[%s6612_s1 + $0x6c0] ss:$8 sps:$4 sm:$0xff]  }
  0xbd   : > { %3170 = vmatprep.subr.bf16.mxu0 %v5154_v39  ;;  %v4110_v39 = vcombine.high %v334_v31, %v342_v32 }
  0xbe   : > { %2787 = vmatmul.mubr.bf16.gmra.mrb[24].mxu1 %v4155_v43  ;;  %v350_v43 = vld [vmem:[%s5575_s23 + $0x210] sm:$0xff] }
  0xbf   : > { %3126 = vmatmul.mubr.bf16.gmra.mrb[24].mxu0 %v4161_v44  ;;  %2832 = vmatpush1.bf16.msra.mxu1 %v5149_v40  ;;  %v4116_v40 = vcombine.high %v337_v33, %v345_v34  ;;  %v358_v44 = vld [vmem:[%s5575_s23 + $0x250] sm:$0xff] }
  0xc0   : > { %3171 = vmatpush1.bf16.msra.mxu0 %v5152_v47  ;;  %2833 = vmatprep.subr.bf16.mxu1 %v5157_v48  ;;  %v5191_v47 = vld [vmem:[%s6612_s1 + $0x660] ss:$8 sps:$4 sm:$0xff]   ;;  %v4109_v48 = vcombine.low %v334_v31, %v342_v32 }
  0xc1   : > { %3172 = vmatprep.subr.bf16.mxu0 %v5160_v49  ;;  %2796 = vmatprep.mubr.bf16.mxu1 %v4172_v50  ;;  %v4115_v49 = vcombine.low %v337_v33, %v345_v34  ;;  %v5196_v50 = vld [vmem:[%s6612_s1 + $0x674] ss:$8 sps:$4 sm:$0xff]   ;;  %v5215_v31 = vld [vmem:[%s6612_s1 + $0x6e0] ss:$8 sps:$4 sm:$0xff]   ;;  %v5218_v34 = vld [vmem:[%s6612_s1 + $0x6f0] ss:$8 sps:$4 sm:$0xff]  }
  0xc2   : > { %3135 = vmatprep.mubr.bf16.mxu0 %v4178_v51  ;;  %v4126_v51 = vcombine.high %v350_v43, %v358_v44  ;;  %v5220_v33 = vld [vmem:[%s6612_s1 + $0x6f4] ss:$8 sps:$4 sm:$0xff]  }
  0xc3   : > { %2834 = vmatpush1.bf16.msra.mxu1 %v5155_v52  ;;  %v4132_v52 = vcombine.high %v353_v45, %v361_v46 }
  0xc4   : > { %3173 = vmatpush1.bf16.msra.mxu0 %v5158_v53  ;;  %2835 = vmatprep.subr.bf16.mxu1 %v5163_v54  ;;  %v5194_v53 = vld [vmem:[%s6612_s1 + $0x670] ss:$8 sps:$4 sm:$0xff]   ;;  %v5199_v54 = vld [vmem:[%s6612_s1 + $0x684] ss:$8 sps:$4 sm:$0xff]  }
  0xc5   : > { %3174 = vmatprep.subr.bf16.mxu0 %v5166_v55  ;;  %v366_v55 = vld [vmem:[%s5575_s23 + $0x290] sm:$0xff] }
  0xc6   : > { %2797 = vmatmul.mubr.bf16.gmra.mrb[28].mxu1 %v4171_v59  ;;  %v4125_v59 = vcombine.low %v350_v43, %v358_v44  ;;  %v4141_v7 = vcombine.low %v366_v55, %v374_v56  ;;  %v5229_v43 = vld [vmem:[%s6612_s1 + $0x724] ss:$8 sps:$4 sm:$0xff]   ;;  %v322_v44 = vld [vmem:[%s5575_s23 + $0x130] sm:$0xff] }
  0xc7   : > { %3136 = vmatmul.mubr.bf16.gmra.mrb[28].mxu0 %v4177_v60  ;;  %2836 = vmatpush1.bf16.msra.mxu1 %v5161_v62  ;;  %v4131_v60 = vcombine.low %v353_v45, %v361_v46  ;;  %v4142_v62 = vcombine.high %v366_v55, %v374_v56  ;;  %v330_v45 = vld [vmem:[%s5575_s23 + $0x170] sm:$0xff]  ;;  %v5233_v55 = vld [vmem:[%s6612_s1 + $0x740] ss:$8 sps:$4 sm:$0xff]  }
  0xc8   : > { %3175 = vmatpush1.bf16.msra.mxu0 %v5164_v63  ;;  %2837 = vmatprep.subr.bf16.mxu1 %v5169_v0  ;;  %v5202_v63 = vld [vmem:[%s6612_s1 + $0x694] ss:$8 sps:$4 sm:$0xff]   ;;  %v4148_v0 = vcombine.high %v369_v57, %v377_v58  ;;  %v5236_v58 = vld [vmem:[%s6612_s1 + $0x750] ss:$8 sps:$4 sm:$0xff]  }
  0xc9   : > { %3176 = vmatprep.subr.bf16.mxu0 %v5172_v1  ;;  %2839 = vmatprep.mubr.bf16.mxu1 %v4062_v2  ;;  %v5200_v1 = vld [vmem:[%s6612_s1 + $0x690] ss:$8 sps:$4 sm:$0xff]   ;;  %v5205_v2 = vld [vmem:[%s6612_s1 + $0x6a4] ss:$8 sps:$4 sm:$0xff]   ;;  %v5238_v57 = vld [vmem:[%s6612_s1 + $0x754] ss:$8 sps:$4 sm:$0xff]  }
  0xca   : > { %3178 = vmatprep.mubr.bf16.mxu0 %v4068_v3  ;;  %v382_v3 = vld [vmem:[%s5575_s23 + $0x310] sm:$0xff] }
  0xcb   : > { %2838 = vmatpush1.bf16.msra.mxu1 %v5167_v4  ;;  %v390_v4 = vld [vmem:[%s5575_s23 + $0x350] sm:$0xff] }
  0xcc   : > { %3177 = vmatpush1.bf16.msra.mxu0 %v5170_v5  ;;  %v385_v5 = vld [vmem:[%s5575_s23 + $0x328] sm:$0xff]  ;;  %v4158_v10 = vcombine.high %v382_v3, %v390_v4  ;;  %v4157_v19 = vcombine.low %v382_v3, %v390_v4  ;;  %v370_v3 = vld [vmem:[%s5575_s23 + $0x2b0] sm:$0xff] }
  0xcd   : > { %3259 = vmatprep.subr.bf16.mxu0 %v5175_v6  ;;  %v393_v6 = vld [vmem:[%s5575_s23 + $0x368] sm:$0xff]  ;;  %v378_v4 = vld [vmem:[%s5575_s23 + $0x2f0] sm:$0xff] }
  0xce   : > { %2840 = vmatmul.mubr.bf16.vlgmr.msra.gmra.mrb[0].mxu1 %v4061_v11  ;;  %v5208_v11 = vld [vmem:[%s6612_s1 + $0x6b4] ss:$8 sps:$4 sm:$0xff]   ;;  %v4163_v20 = vcombine.low %v385_v5, %v393_v6 }
  0xcf   : > { %3179 = vmatmul.mubr.bf16.vlgmr.msra.gmra.mrb[0].mxu0 %v4067_v12  ;;  %2849 = vmatprep.mubr.bf16.mxu1 %v4078_v14  ;;  %v4164_v12 = vcombine.high %v385_v5, %v393_v6  ;;  %v5211_v14 = vld [vmem:[%s6612_s1 + $0x6c4] ss:$8 sps:$4 sm:$0xff]  }
  0xd0   : > { %3260 = vmatpush1.bf16.msra.mxu0 %v5173_v13  ;;  %3188 = vmatprep.mubr.bf16.mxu0 %v4084_v16  ;;  %v5206_v13 = vld [vmem:[%s6612_s1 + $0x6b0] ss:$8 sps:$4 sm:$0xff]   ;;  %v5247_v5 = vld [vmem:[%s6612_s1 + $0x784] ss:$8 sps:$4 sm:$0xff]  }
  0xd1   : > { %3261 = vmatprep.subr.bf16.mxu0 %v5178_v15  ;;  %v398_v15 = vld [vmem:[%s5575_s23 + $0x390] sm:$0xff] }
  0xd2   : > { %v406_v16 = vld [vmem:[%s5575_s23 + $0x3d0] sm:$0xff] }
  0xd3   : > { %v4174_v22 = vcombine.high %v398_v15, %v406_v16 }
  0xd4   : > { %3262 = vmatpush1.bf16.msra.mxu0 %v5176_v17  ;;  %v401_v17 = vld [vmem:[%s5575_s23 + $0x3a8] sm:$0xff] }
  0xd5   : > { %3263 = vmatprep.subr.bf16.mxu0 %v5181_v18  ;;  %v409_v18 = vld [vmem:[%s5575_s23 + $0x3e8] sm:$0xff] }
  0xd6   : > { %2850 = vmatmul.mubr.bf16.gmra.mrb[4].mxu1 %v4077_v23  ;;  %v5214_v23 = vld [vmem:[%s6612_s1 + $0x6d4] ss:$8 sps:$4 sm:$0xff]  }
  0xd7   : > { %3189 = vmatmul.mubr.bf16.gmra.mrb[4].mxu0 %v4083_v24  ;;  %2859 = vmatprep.mubr.bf16.mxu1 %v4094_v26  ;;  %v4180_v24 = vcombine.high %v401_v17, %v409_v18  ;;  %v5217_v26 = vld [vmem:[%s6612_s1 + $0x6e4] ss:$8 sps:$4 sm:$0xff]  }
  0xd8   : > { %3264 = vmatpush1.bf16.msra.mxu0 %v5179_v25  ;;  %3198 = vmatprep.mubr.bf16.mxu0 %v4100_v28  ;;  %v5212_v25 = vld [vmem:[%s6612_s1 + $0x6d0] ss:$8 sps:$4 sm:$0xff]  }
  0xd9   : > { %3265 = vmatprep.subr.bf16.mxu0 %v5184_v27  ;;  %v290_v27 = vld [vmem:[%s5575_s23 + $0x30] sm:$0xff] }
  0xda   : > { %v298_v28 = vld [vmem:[%s5575_s23 + $0x70] sm:$0xff] }
  0xdb   : > { %v4070_v32 = vcombine.high %v290_v27, %v298_v28 }
  0xdc   : > { %3266 = vmatpush1.bf16.msra.mxu0 %v5182_v29  ;;  %v4173_v29 = vcombine.low %v398_v15, %v406_v16  ;;  %v5251_v16 = vld [vmem:[%s6612_s1 + $0x7a0] ss:$8 sps:$4 sm:$0xff]  }
  0xdd   : > { %3267 = vmatprep.subr.bf16.mxu0 %v5187_v30  ;;  %v4179_v30 = vcombine.low %v401_v17, %v409_v18  ;;  %v5256_v17 = vld [vmem:[%s6612_s1 + $0x7b4] ss:$8 sps:$4 sm:$0xff]   ;;  %v5254_v18 = vld [vmem:[%s6612_s1 + $0x7b0] ss:$8 sps:$4 sm:$0xff]  }
  0xde   : > { %2860 = vmatmul.mubr.bf16.gmra.mrb[8].mxu1 %v4093_v36  ;;  %v306_v36 = vld [vmem:[%s5575_s23 + $0xb0] sm:$0xff] }
  0xdf   : > { %3199 = vmatmul.mubr.bf16.gmra.mrb[8].mxu0 %v4099_v37  ;;  %2869 = vmatprep.mubr.bf16.mxu1 %v4110_v39  ;;  %v314_v37 = vld [vmem:[%s5575_s23 + $0xf0] sm:$0xff]  ;;  %v5221_v39 = vld [vmem:[%s6612_s1 + $0x700] ss:$8 sps:$4 sm:$0xff]  }
  0xe0   : > { %3268 = vmatpush1.bf16.msra.mxu0 %v5185_v35  ;;  %3208 = vmatprep.mubr.bf16.mxu0 %v4116_v40  ;;  %v5223_v35 = vld [vmem:[%s6612_s1 + $0x704] ss:$8 sps:$4 sm:$0xff]   ;;  %v4086_v40 = vcombine.high %v306_v36, %v314_v37  ;;  %v4085_v46 = vcombine.low %v306_v36, %v314_v37  ;;  %v339_v37 = vld [vmem:[%s5575_s23 + $0x1b8] sm:$0xff] }
  0xe1   : > { %3269 = vmatprep.subr.bf16.mxu0 %v5190_v38  ;;  %v4069_v38 = vcombine.low %v290_v27, %v298_v28 }
  0xe4   : > { %3270 = vmatpush1.bf16.msra.mxu0 %v5188_v41  ;;  %v5226_v41 = vld [vmem:[%s6612_s1 + $0x714] ss:$8 sps:$4 sm:$0xff]  }
  0xe5   : > { %3271 = vmatprep.subr.bf16.mxu0 %v5193_v42  ;;  %v5224_v42 = vld [vmem:[%s6612_s1 + $0x710] ss:$8 sps:$4 sm:$0xff]  }
  0xe6   : > { %2870 = vmatmul.mubr.bf16.gmra.mrb[12].mxu1 %v4109_v48  ;;  %v4102_v48 = vcombine.high %v322_v44, %v330_v45 }
  0xe7   : > { %3209 = vmatmul.mubr.bf16.gmra.mrb[12].mxu0 %v4115_v49  ;;  %2879 = vmatprep.mubr.bf16.mxu1 %v4126_v51  ;;  %v5232_v49 = vld [vmem:[%s6612_s1 + $0x734] ss:$8 sps:$4 sm:$0xff]   ;;  %v5235_v51 = vld [vmem:[%s6612_s1 + $0x744] ss:$8 sps:$4 sm:$0xff]  }
  0xe8   : > { %3272 = vmatpush1.bf16.msra.mxu0 %v5191_v47  ;;  %3218 = vmatprep.mubr.bf16.mxu0 %v4132_v52  ;;  %v5227_v47 = vld [vmem:[%s6612_s1 + $0x720] ss:$8 sps:$4 sm:$0xff]   ;;  %v338_v52 = vld [vmem:[%s5575_s23 + $0x1b0] sm:$0xff] }
  0xe9   : > { %3273 = vmatprep.subr.bf16.mxu0 %v5196_v50  ;;  %v5230_v50 = vld [vmem:[%s6612_s1 + $0x730] ss:$8 sps:$4 sm:$0xff]  }
  0xec   : > { %3274 = vmatpush1.bf16.msra.mxu0 %v5194_v53  ;;  %v346_v53 = vld [vmem:[%s5575_s23 + $0x1f0] sm:$0xff] }
  0xed   : > { %3275 = vmatprep.subr.bf16.mxu0 %v5199_v54  ;;  %v4101_v54 = vcombine.low %v322_v44, %v330_v45  ;;  %v4118_v56 = vcombine.high %v338_v52, %v346_v53  ;;  %v355_v44 = vld [vmem:[%s5575_s23 + $0x238] sm:$0xff] }
  0xee   : > { %2880 = vmatmul.mubr.bf16.gmra.mrb[16].mxu1 %v4125_v59  ;;  %v5241_v59 = vld [vmem:[%s6612_s1 + $0x764] ss:$8 sps:$4 sm:$0xff]   ;;  %v363_v45 = vld [vmem:[%s5575_s23 + $0x278] sm:$0xff] }
  0xef   : > { %3219 = vmatmul.mubr.bf16.gmra.mrb[16].mxu0 %v4131_v60  ;;  %2889 = vmatprep.mubr.bf16.mxu1 %v4142_v62  ;;  %v354_v60 = vld [vmem:[%s5575_s23 + $0x230] sm:$0xff]  ;;  %v4117_v62 = vcombine.low %v338_v52, %v346_v53  ;;  %v371_v52 = vld [vmem:[%s5575_s23 + $0x2b8] sm:$0xff] }
  0xf0   : > { %3276 = vmatpush1.bf16.msra.mxu0 %v5197_v61  ;;  %3228 = vmatprep.mubr.bf16.mxu0 %v4148_v0  ;;  %v362_v61 = vld [vmem:[%s5575_s23 + $0x270] sm:$0xff]  ;;  %v379_v53 = vld [vmem:[%s5575_s23 + $0x2f8] sm:$0xff] }
  0xf1   : > { %3277 = vmatprep.subr.bf16.mxu0 %v5202_v63  ;;  %v5239_v63 = vld [vmem:[%s6612_s1 + $0x760] ss:$8 sps:$4 sm:$0xff]   ;;  %v4134_v0 = vcombine.high %v354_v60, %v362_v61  ;;  %v4133_v6 = vcombine.low %v354_v60, %v362_v61  ;;  %v387_v60 = vld [vmem:[%s5575_s23 + $0x338] sm:$0xff] }
  0xf2   : > { %v395_v61 = vld [vmem:[%s5575_s23 + $0x378] sm:$0xff] }
  0xf4   : > { %3278 = vmatpush1.bf16.msra.mxu0 %v5200_v1  ;;  %v5244_v1 = vld [vmem:[%s6612_s1 + $0x774] ss:$8 sps:$4 sm:$0xff]  }
  0xf5   : > { %3279 = vmatprep.subr.bf16.mxu0 %v5205_v2  ;;  %v5242_v2 = vld [vmem:[%s6612_s1 + $0x770] ss:$8 sps:$4 sm:$0xff]  }
  0xf6   : > { %2890 = vmatmul.mubr.bf16.gmra.mrb[20].mxu1 %v4141_v7  ;;  %v4150_v7 = vcombine.high %v370_v3, %v378_v4 }
  0xf7   : > { %3229 = vmatmul.mubr.bf16.gmra.mrb[20].mxu0 %v4147_v8  ;;  %2899 = vmatprep.mubr.bf16.mxu1 %v4158_v10  ;;  %v5245_v8 = vld [vmem:[%s6612_s1 + $0x780] ss:$8 sps:$4 sm:$0xff]   ;;  %v5248_v10 = vld [vmem:[%s6612_s1 + $0x790] ss:$8 sps:$4 sm:$0xff]  }
  0xf8   : > { %3280 = vmatpush1.bf16.msra.mxu0 %v5203_v9  ;;  %3238 = vmatprep.mubr.bf16.mxu0 %v4164_v12  ;;  %v5250_v9 = vld [vmem:[%s6612_s1 + $0x794] ss:$8 sps:$4 sm:$0xff]  }
  0xf9   : > { %3281 = vmatprep.subr.bf16.mxu0 %v5208_v11  ;;  %v386_v11 = vld [vmem:[%s5575_s23 + $0x330] sm:$0xff] }
  0xfa   : > { %v394_v12 = vld [vmem:[%s5575_s23 + $0x370] sm:$0xff] }
  0xfb   : > { %v4166_v15 = vcombine.high %v386_v11, %v394_v12 }
  0xfc   : > { %3282 = vmatpush1.bf16.msra.mxu0 %v5206_v13  ;;  %v5253_v13 = vld [vmem:[%s6612_s1 + $0x7a4] ss:$8 sps:$4 sm:$0xff]  }
  0xfd   : > { %3283 = vmatprep.subr.bf16.mxu0 %v5211_v14  ;;  %v4149_v14 = vcombine.low %v370_v3, %v378_v4  ;;  %v403_v3 = vld [vmem:[%s5575_s23 + $0x3b8] sm:$0xff] }
  0xfe   : > { %2900 = vmatmul.mubr.bf16.gmra.mrb[24].mxu1 %v4157_v19  ;;  %v402_v19 = vld [vmem:[%s5575_s23 + $0x3b0] sm:$0xff]  ;;  %v411_v4 = vld [vmem:[%s5575_s23 + $0x3f8] sm:$0xff] }
  0xff   : > { %3239 = vmatmul.mubr.bf16.gmra.mrb[24].mxu0 %v4163_v20  ;;  %2909 = vmatprep.mubr.bf16.mxu1 %v4174_v22  ;;  %v410_v20 = vld [vmem:[%s5575_s23 + $0x3f0] sm:$0xff]  ;;  %v4165_v22 = vcombine.low %v386_v11, %v394_v12  ;;  %v5274_v12 = vld [vmem:[%s6614_s3 + $0x78] sm:$0xff]  }
 0x100   : > { %3284 = vmatpush1.bf16.msra.mxu0 %v5209_v21  ;;  %3248 = vmatprep.mubr.bf16.mxu0 %v4180_v24  ;;  %v5259_v21 = vld [vmem:[%s6612_s1 + $0x7c4] ss:$8 sps:$4 sm:$0xff]   ;;  %v5257_v24 = vld [vmem:[%s6612_s1 + $0x7c0] ss:$8 sps:$4 sm:$0xff]   ;;  %v4181_v27 = vcombine.low %v402_v19, %v410_v20 }
 0x101   : > { %3285 = vmatprep.subr.bf16.mxu0 %v5214_v23  ;;  %v4182_v23 = vcombine.high %v402_v19, %v410_v20 }
 0x104   : > { %3286 = vmatpush1.bf16.msra.mxu0 %v5212_v25  ;;  %v291_v25 = vld [vmem:[%s5575_s23 + $0x38] sm:$0xff] }
 0x105   : > { %3287 = vmatprep.subr.bf16.mxu0 %v5217_v26  ;;  %v299_v26 = vld [vmem:[%s5575_s23 + $0x78] sm:$0xff] }
 0x106   : > { %2910 = vmatmul.mubr.bf16.gmra.mrb[28].mxu1 %v4173_v29  ;;  %v4072_v28 = vcombine.high %v291_v25, %v299_v26  ;;  %v307_v29 = vld [vmem:[%s5575_s23 + $0xb8] sm:$0xff] }
 0x107   : > { %3249 = vmatmul.mubr.bf16.gmra.mrb[28].mxu0 %v4179_v30  ;;  %v315_v30 = vld [vmem:[%s5575_s23 + $0xf8] sm:$0xff] }
 0x108   : > { %3288 = vmatpush1.bf16.msra.mxu0 %v5215_v31  ;;  %3291 = vmatprep.mubr.bf16.mxu0 %v4070_v32  ;;  %v4071_v31 = vcombine.low %v291_v25, %v299_v26  ;;  %v4088_v32 = vcombine.high %v307_v29, %v315_v30 }
 0x109   : > { %3289 = vmatprep.subr.bf16.mxu0 %v5220_v33  ;;  %v323_v33 = vld [vmem:[%s5575_s23 + $0x138] sm:$0xff] }
 0x10c   : > { %3290 = vmatpush1.bf16.msra.mxu0 %v5218_v34  ;;  %v331_v34 = vld [vmem:[%s5575_s23 + $0x178] sm:$0xff] }
 0x10d   : > { %3372 = vmatprep.subr.bf16.mxu0 %v5223_v35  ;;  %v4087_v35 = vcombine.low %v307_v29, %v315_v30  ;;  %v4104_v36 = vcombine.high %v323_v33, %v331_v34 }
 0x10f   : > { %3292 = vmatmul.mubr.bf16.vlgmr.msra.gmra.mrb[0].mxu0 %v4069_v38  ;;  %v347_v38 = vld [vmem:[%s5575_s23 + $0x1f8] sm:$0xff] }
 0x110   : > { %3373 = vmatpush1.bf16.msra.mxu0 %v5221_v39  ;;  %3301 = vmatprep.mubr.bf16.mxu0 %v4086_v40  ;;  %v4103_v39 = vcombine.low %v323_v33, %v331_v34  ;;  %v4120_v40 = vcombine.high %v339_v37, %v347_v38 }
 0x111   : > { %3374 = vmatprep.subr.bf16.mxu0 %v5226_v41  ;;  %v5260_v41 = vld [vmem:[%s6614_s3 + $0x40] sm:$0xff]  }
 0x112   : > { %4476 = vmatprep.subr.bf16.mxu1 %v5260_v41 }
 0x114   : > { %3375 = vmatpush1.bf16.msra.mxu0 %v5224_v42  ;;  %v5261_v42 = vld [vmem:[%s6614_s3] sm:$0xff]  }
 0x115   : > { %3376 = vmatprep.subr.bf16.mxu0 %v5229_v43  ;;  %v5262_v43 = vld [vmem:[%s6614_s3 + $0x48] sm:$0xff]   ;;  %4477 = vmatpush3.bf16.msra.mxu1 %v5261_v42  ;;  %v5276_v42 = vld [vmem:[%s6616_s5] sm:$0xff]  }
 0x116   : > { %4478 = vmatprep.subr.bf16.mxu1 %v5262_v43  ;;  %v664_v43 = vlaneseq }
 0x117   : > { %3302 = vmatmul.mubr.bf16.gmra.mrb[4].mxu0 %v4085_v46  ;;  %v5263_v46 = vld [vmem:[%s6614_s3 + $0x8] sm:$0xff]  }
 0x118   : > { %3377 = vmatpush1.bf16.msra.mxu0 %v5227_v47  ;;  %3311 = vmatprep.mubr.bf16.mxu0 %v4102_v48  ;;  %v5264_v47 = vld [vmem:[%s6614_s3 + $0x50] sm:$0xff]   ;;  %v4119_v48 = vcombine.low %v339_v37, %v347_v38 }
 0x119   : > { %3378 = vmatprep.subr.bf16.mxu0 %v5232_v49  ;;  %v4136_v49 = vcombine.high %v355_v44, %v363_v45  ;;  %4479 = vmatpush3.bf16.msra.mxu1 %v5263_v46  ;;  %v662_v46 = vld [vmem:[%s6613_s2] sm:$0x3] }
 0x11a   : > { %4480 = vmatprep.subr.bf16.mxu1 %v5264_v47 }
 0x11c   : > { %3379 = vmatpush1.bf16.msra.mxu0 %v5230_v50  ;;  %v5265_v50 = vld [vmem:[%s6614_s3 + $0x10] sm:$0xff]  }
 0x11d   : > { %3380 = vmatprep.subr.bf16.mxu0 %v5235_v51  ;;  %v5266_v51 = vld [vmem:[%s6614_s3 + $0x58] sm:$0xff]   ;;  %4481 = vmatpush3.bf16.msra.mxu1 %v5265_v50 }
 0x11e   : > { %4482 = vmatprep.subr.bf16.mxu1 %v5266_v51 }
 0x11f   : > { %3312 = vmatmul.mubr.bf16.gmra.mrb[8].mxu0 %v4101_v54  ;;  %v5267_v54 = vld [vmem:[%s6614_s3 + $0x18] sm:$0xff]  }
 0x120   : > { %3381 = vmatpush1.bf16.msra.mxu0 %v5233_v55  ;;  %3321 = vmatprep.mubr.bf16.mxu0 %v4118_v56  ;;  %v5268_v55 = vld [vmem:[%s6614_s3 + $0x60] sm:$0xff]   ;;  %v4135_v56 = vcombine.low %v355_v44, %v363_v45  ;;  %v665_v44 = vshrl.u32 %v664_v43, 7 }
 0x121   : > { %3382 = vmatprep.subr.bf16.mxu0 %v5238_v57  ;;  %v4152_v57 = vcombine.high %v371_v52, %v379_v53  ;;  %4483 = vmatpush3.bf16.msra.mxu1 %v5267_v54 }
 0x122   : > { %4484 = vmatprep.subr.bf16.mxu1 %v5268_v55  ;;  %v666_v45 = vsub.s32 0, %v665_v44  ;;  %v670_v47 = vsub.s32 1, %v665_v44 }
 0x124   : > { %3383 = vmatpush1.bf16.msra.mxu0 %v5236_v58  ;;  %v5269_v58 = vld [vmem:[%s6614_s3 + $0x20] sm:$0xff]  }
 0x125   : > { %3384 = vmatprep.subr.bf16.mxu0 %v5241_v59  ;;  %v5270_v59 = vld [vmem:[%s6614_s3 + $0x68] sm:$0xff]   ;;  %4485 = vmatpush3.bf16.msra.mxu1 %v5269_v58 }
 0x126   : > { %4486 = vmatprep.subr.bf16.mxu1 %v5270_v59 }
 0x127   : > { %3322 = vmatmul.mubr.bf16.gmra.mrb[12].mxu0 %v4117_v62  ;;  %v5271_v62 = vld [vmem:[%s6614_s3 + $0x28] sm:$0xff]  }
 0x128   : > { %3331 = vmatprep.mubr.bf16.mxu0 %v4134_v0  ;;  %3385 = vmatpush1.bf16.msra.mxu0 %v5239_v63  ;;  %v5272_v63 = vld [vmem:[%s6614_s3 + $0x70] sm:$0xff]   ;;  %v4151_v0 = vcombine.low %v371_v52, %v379_v53 }
 0x129   : > { %3386 = vmatprep.subr.bf16.mxu0 %v5244_v1  ;;  %v4168_v1 = vcombine.high %v387_v60, %v395_v61  ;;  %4487 = vmatpush3.bf16.msra.mxu1 %v5271_v62 }
 0x12a   : > { %4488 = vmatprep.subr.bf16.mxu1 %v5272_v63 }
 0x12c   : > { %3387 = vmatpush1.bf16.msra.mxu0 %v5242_v2  ;;  %v5273_v2 = vld [vmem:[%s6614_s3 + $0x30] sm:$0xff]  }
 0x12d   : > { %3388 = vmatprep.subr.bf16.mxu0 %v5247_v5  ;;  %4489 = vmatpush3.bf16.msra.mxu1 %v5273_v2  ;;  %v4167_v5 = vcombine.low %v387_v60, %v395_v61 }
 0x12e   : > { %4490 = vmatprep.subr.bf16.mxu1 %v5274_v12 }
 0x12f   : > { %3332 = vmatmul.mubr.bf16.gmra.mrb[16].mxu0 %v4133_v6  ;;  %v4184_v6 = vcombine.high %v403_v3, %v411_v4 }
 0x130   : > { %3341 = vmatprep.mubr.bf16.mxu0 %v4150_v7  ;;  %3389 = vmatpush1.bf16.msra.mxu0 %v5245_v8  ;;  %v4183_v7 = vcombine.low %v403_v3, %v411_v4 }
 0x131   : > { %3390 = vmatprep.subr.bf16.mxu0 %v5250_v9 }
 0x134   : > { %3391 = vmatpush1.bf16.msra.mxu0 %v5248_v10 }
 0x135   : > { %3392 = vmatprep.subr.bf16.mxu0 %v5253_v13  ;;  %v5275_v13 = vld [vmem:[%s6614_s3 + $0x38] sm:$0xff]  }
 0x136   : > { %4491 = vmatpush3.bf16.msra.mxu1 %v5275_v13 }
 0x137   : > { %3342 = vmatmul.mubr.bf16.gmra.mrb[20].mxu0 %v4149_v14  ;;  %4556 = vmatprep.subr.bf16.mxu1 %v5276_v42 }
 0x138   : > { %3351 = vmatprep.mubr.bf16.mxu0 %v4166_v15  ;;  %3393 = vmatpush1.bf16.msra.mxu0 %v5251_v16 }
 0x139   : > { %3394 = vmatprep.subr.bf16.mxu0 %v5256_v17 }
 0x13c   : > { %3395 = vmatpush1.bf16.msra.mxu0 %v5254_v18 }
 0x13d   : > { %3396 = vmatprep.subr.bf16.mxu0 %v5259_v21 }
 0x13f   : > { %3352 = vmatmul.mubr.bf16.gmra.mrb[24].mxu0 %v4165_v22 }
 0x140   : > { %3361 = vmatprep.mubr.bf16.mxu0 %v4182_v23  ;;  %3397 = vmatpush1.bf16.msra.mxu0 %v5257_v24 }
 0x147   : > { %3362 = vmatmul.mubr.bf16.gmra.mrb[28].mxu0 %v4181_v27 }
 0x148   : > { %4435 = vmatprep.mubr.msk.bf16.mxu0 %vm2556_vm0, %v4072_v28 }
 0x14f   : > { %3405 = vmatmul.mubr.bf16.vlgmr.msra.gmra.mrb[0].mxu0 %v4071_v31 }
 0x150   : > { %4436 = vmatprep.mubr.msk.bf16.mxu0 %vm2556_vm0, %v4088_v32 }
 0x157   : > { %3415 = vmatmul.mubr.bf16.gmra.mrb[4].mxu0 %v4087_v35 }
 0x158   : > { %4437 = vmatprep.mubr.msk.bf16.mxu0 %vm2556_vm0, %v4104_v36 }
 0x15f   : > { %3425 = vmatmul.mubr.bf16.gmra.mrb[8].mxu0 %v4103_v39 }
 0x160   : > { %4438 = vmatprep.mubr.msk.bf16.mxu0 %vm2556_vm0, %v4120_v40 }
 0x167   : > { %3435 = vmatmul.mubr.bf16.gmra.mrb[12].mxu0 %v4119_v48  ;;  %v6433_v48 = vrot.slane %v662_v46, %v666_v45 }
 0x168   : > { %4439 = vmatprep.mubr.msk.bf16.mxu0 %vm2556_vm0, %v4136_v49  ;;  %v6435_v49 = vrot.slane %v662_v46, %v670_v47 }
 0x16f   : > { %3445 = vmatmul.mubr.bf16.gmra.mrb[16].mxu0 %v4135_v56 }
 0x170   : > { %4440 = vmatprep.mubr.msk.bf16.mxu0 %vm2556_vm0, %v4152_v57 }
 0x177   : > { %3455 = vmatmul.mubr.bf16.gmra.mrb[20].mxu0 %v4151_v0 }
 0x178   : > { %4441 = vmatprep.mubr.msk.bf16.mxu0 %vm2556_vm0, %v4168_v1 }
 0x17f   : > { %3465 = vmatmul.mubr.bf16.gmra.mrb[24].mxu0 %v4167_v5 }
 0x180   : > { %4442 = vmatprep.mubr.msk.bf16.mxu0 %vm2556_vm0, %v4184_v6 }
 0x187   : > { %3475 = vmatmul.mubr.bf16.gmra.mrb[28].mxu0 %v4183_v7 }
 0x1a1   : > { %v2841_v8 = vpop.f32.mrb[0].mxu1 }
 0x1a2   : > { %v2843_v9 = vpop.f32.mrb[1].mxu1  ;;  %v4588_v50 = vadd.f32 %v2841_v8, %v6433_v48 }
 0x1a3   : > { %v2845_v10 = vpop.f32.mrb[2].mxu1  ;;  %v4590_v51 = vadd.f32 %v2843_v9, %v6435_v49 }
 0x1a4   : > { %v2847_v11 = vpop.f32.mrb[3].mxu1  ;;  %v4592_v53 = vadd.f32 %v2845_v10, %v6433_v48  ;;  %v5277_v10 = vld [vmem:[%s6616_s5 + $0x8] sm:$0xff]  }
 0x1a5   : > { %v4594_v56 = vadd.f32 %v2847_v11, %v6435_v49 }
 0x1a9   : > { %v2851_v14 = vpop.f32.mrb[4].mxu1 }
 0x1aa   : > { %v2853_v15 = vpop.f32.mrb[5].mxu1  ;;  %v4596_v2 = vadd.f32 %v2851_v14, %v6433_v48 }
 0x1ab   : > { %v2855_v16 = vpop.f32.mrb[6].mxu1  ;;  %v4598_v4 = vadd.f32 %v2853_v15, %v6435_v49 }
 0x1ac   : > { %v2857_v17 = vpop.f32.mrb[7].mxu1  ;;  %v4600_v7 = vadd.f32 %v2855_v16, %v6433_v48  ;;  %v5278_v16 = vld [vmem:[%s6616_s5 + $0x10] sm:$0xff]  }
 0x1ad   : > { %v4602_v11 = vadd.f32 %v2857_v17, %v6435_v49 }
 0x1b1   : > { %v6379_v18 = vpop.f32.mrb[8].mxu1 }
 0x1b2   : > { %v6381_v19 = vpop.f32.mrb[9].mxu1  ;;  %v4604_v17 = vadd.f32 %v6379_v18, %v6433_v48 }
 0x1b3   : > { %v6383_v20 = vpop.f32.mrb[10].mxu1 }
 0x1b4   : > { %v6385_v21 = vpop.f32.mrb[11].mxu1 }
 0x1b9   : > { %v6387_v22 = vpop.f32.mrb[12].mxu1 }
 0x1ba   : > { %v6389_v23 = vpop.f32.mrb[13].mxu1 }
 0x1bb   : > { %v6391_v24 = vpop.f32.mrb[14].mxu1 }
 0x1bc   : > { %v6393_v25 = vpop.f32.mrb[15].mxu1 }
 0x1c1   : > { %v6395_v26 = vpop.f32.mrb[16].mxu1 }
 0x1c2   : > { %v6397_v27 = vpop.f32.mrb[17].mxu1 }
 0x1c3   : > { %v6399_v28 = vpop.f32.mrb[18].mxu1 }
 0x1c4   : > { %v6401_v29 = vpop.f32.mrb[19].mxu1 }
 0x1c9   : > { %v6403_v30 = vpop.f32.mrb[20].mxu1 }
 0x1ca   : > { %v6405_v31 = vpop.f32.mrb[21].mxu1 }
 0x1cb   : > { %v6407_v32 = vpop.f32.mrb[22].mxu1 }
 0x1cc   : > { %v6409_v33 = vpop.f32.mrb[23].mxu1 }
 0x1d1   : > { %v6411_v34 = vpop.f32.mrb[24].mxu1 }
 0x1d2   : > { %v6413_v35 = vpop.f32.mrb[25].mxu1 }
 0x1d3   : > { %v6415_v36 = vpop.f32.mrb[26].mxu1 }
 0x1d4   : > { %v6417_v37 = vpop.f32.mrb[27].mxu1 }
 0x1d9   : > { %v6419_v38 = vpop.f32.mrb[28].mxu1 }
 0x1da   : > { %v6421_v39 = vpop.f32.mrb[29].mxu1 }
 0x1db   : > { %v6423_v40 = vpop.f32.mrb[30].mxu1 }
 0x1dc   : > { %v6425_v41 = vpop.f32.mrb[31].mxu1 }
 0x222   : > { %v3406_v52 = vpop.f32.mrb[0].mxu0 }
 0x223   : > { %v4589_v54 = vadd.f32 %v4588_v50, %v3406_v52  ;;  %v3408_v55 = vpop.f32.mrb[1].mxu0 }
 0x224   : > { %v4591_v57 = vadd.f32 %v4590_v51, %v3408_v55  ;;  %v3410_v58 = vpop.f32.mrb[2].mxu0  ;;  %v4606_v51 = vadd.f32 %v6381_v19, %v6435_v49 }
 0x225   : > { %v4593_v59 = vadd.f32 %v4592_v53, %v3410_v58  ;;  %v3412_v60 = vpop.f32.mrb[3].mxu0  ;;  %v3485_v62 = vmax.f32 %v4589_v54, 0.0 }
 0x226   : > { %v4595_v61 = vadd.f32 %v4594_v56, %v3412_v60  ;;  %v3486_v0 = vmax.f32 %v4591_v57, 0.0  ;;  %v4610_v56 = vadd.f32 %v6385_v21, %v6435_v49 }
 0x227   : > { %v3487_v63 = vmax.f32 %v4593_v59, 0.0 }
 0x228   : > { %v3488_v1 = vmax.f32 %v4595_v61, 0.0 }
 0x229   : > { %v3517_v3 = vpack.c.bf16 %v3487_v63, %v3485_v62 }
 0x22a   : > { %v3518_v5 = vpack.c.bf16 %v3488_v1, %v3486_v0  ;;  %v3416_v6 = vpop.f32.mrb[4].mxu0  ;;  %v4614_v1 = vadd.f32 %v6389_v23, %v6435_v49 }
 0x22b   : > { %v4597_v8 = vadd.f32 %v4596_v2, %v3416_v6  ;;  %v3418_v9 = vpop.f32.mrb[5].mxu0  ;;  %v4618_v6 = vadd.f32 %v6393_v25, %v6435_v49 }
 0x22c   : > { %v4599_v12 = vadd.f32 %v4598_v4, %v3418_v9  ;;  %v3420_v13 = vpop.f32.mrb[6].mxu0  ;;  %3700 = vmatprep.mubr.bf16.mxu1 %v3518_v5 }
 0x22d   : > { %v4601_v43 = vadd.f32 %v4600_v7, %v3420_v13  ;;  %v3422_v14 = vpop.f32.mrb[7].mxu0  ;;  %3701 = vmatmul.mubr.bf16.vlgmr.msra.gmra.mrb[32].mxu1 %v3517_v3  ;;  %v3489_v15 = vmax.f32 %v4597_v8, 0.0  ;;  %v4616_v3 = vadd.f32 %v6391_v24, %v6433_v48 }
 0x22e   : > { %v4603_v44 = vadd.f32 %v4602_v11, %v3422_v14  ;;  %4557 = vmatpush3.bf16.msra.mxu1 %v5276_v42  ;;  %v3490_v46 = vmax.f32 %v4599_v12, 0.0  ;;  %v4608_v42 = vadd.f32 %v6383_v20, %v6433_v48  ;;  %v4612_v20 = vadd.f32 %v6387_v22, %v6433_v48 }
 0x22f   : > { %v3491_v45 = vmax.f32 %v4601_v43, 0.0  ;;  %4558 = vmatprep.subr.bf16.mxu1 %v5277_v10  ;;  %v4620_v43 = vadd.f32 %v6395_v26, %v6433_v48  ;;  %v4622_v14 = vadd.f32 %v6397_v27, %v6435_v49 }
 0x230   : > { %v3492_v47 = vmax.f32 %v4603_v44, 0.0 }
 0x231   : > { %v3519_v50 = vpack.c.bf16 %v3491_v45, %v3489_v15  ;;  %v4624_v15 = vadd.f32 %v6399_v28, %v6433_v48 }
 0x232   : > { %v3520_v52 = vpack.c.bf16 %v3492_v47, %v3490_v46  ;;  %v3426_v53 = vpop.f32.mrb[8].mxu0  ;;  %4559 = vmatpush3.bf16.msra.mxu1 %v5277_v10  ;;  %v4626_v46 = vadd.f32 %v6401_v29, %v6435_v49 }
 0x233   : > { %v4605_v54 = vadd.f32 %v4604_v17, %v3426_v53  ;;  %v3428_v55 = vpop.f32.mrb[9].mxu0  ;;  %4560 = vmatprep.subr.bf16.mxu1 %v5278_v16 }
 0x234   : > { %v4607_v57 = vadd.f32 %v4606_v51, %v3428_v55  ;;  %v3430_v58 = vpop.f32.mrb[10].mxu0  ;;  %3708 = vmatprep.mubr.bf16.mxu1 %v3520_v52  ;;  %v4630_v55 = vadd.f32 %v6405_v31, %v6435_v49 }
 0x235   : > { %v4609_v18 = vadd.f32 %v4608_v42, %v3430_v58  ;;  %v3432_v59 = vpop.f32.mrb[11].mxu0  ;;  %3709 = vmatmul.mubr.bf16.gmra.mrb[36].mxu1 %v3519_v50  ;;  %v3493_v19 = vmax.f32 %v4605_v54, 0.0  ;;  %v4628_v54 = vadd.f32 %v6403_v30, %v6433_v48 }
 0x236   : > { %v4611_v60 = vadd.f32 %v4610_v56, %v3432_v59  ;;  %4561 = vmatpush3.bf16.msra.mxu1 %v5278_v16  ;;  %v3494_v62 = vmax.f32 %v4607_v57, 0.0  ;;  %v4632_v57 = vadd.f32 %v6407_v32, %v6433_v48  ;;  %v4634_v59 = vadd.f32 %v6409_v33, %v6435_v49 }
 0x237   : > { %v3495_v61 = vmax.f32 %v4609_v18, 0.0 }
 0x238   : > { %v3496_v63 = vmax.f32 %v4611_v60, 0.0 }
 0x239   : > { %v3521_v0 = vpack.c.bf16 %v3495_v61, %v3493_v19 }
 0x23a   : > { %v3522_v21 = vpack.c.bf16 %v3496_v63, %v3494_v62  ;;  %v3436_v2 = vpop.f32.mrb[12].mxu0 }
 0x23b   : > { %v4613_v4 = vadd.f32 %v4612_v20, %v3436_v2  ;;  %v3438_v5 = vpop.f32.mrb[13].mxu0 }
 0x23c   : > { %v4615_v7 = vadd.f32 %v4614_v1, %v3438_v5  ;;  %v3440_v8 = vpop.f32.mrb[14].mxu0  ;;  %3716 = vmatprep.mubr.bf16.mxu1 %v3522_v21  ;;  %v4636_v1 = vadd.f32 %v6411_v34, %v6433_v48  ;;  %v4638_v21 = vadd.f32 %v6413_v35, %v6435_v49 }
 0x23d   : > { %v4617_v9 = vadd.f32 %v4616_v3, %v3440_v8  ;;  %v3442_v10 = vpop.f32.mrb[15].mxu0  ;;  %3717 = vmatmul.mubr.bf16.gmra.mrb[40].mxu1 %v3521_v0  ;;  %v3497_v11 = vmax.f32 %v4613_v4, 0.0  ;;  %v4640_v3 = vadd.f32 %v6415_v36, %v6433_v48 }
 0x23e   : > { %v4619_v22 = vadd.f32 %v4618_v6, %v3442_v10  ;;  %v3498_v23 = vmax.f32 %v4615_v7, 0.0  ;;  %v4642_v6 = vadd.f32 %v6417_v37, %v6435_v49 }
 0x23f   : > { %v3499_v12 = vmax.f32 %v4617_v9, 0.0 }
 0x240   : > { %v3500_v13 = vmax.f32 %v4619_v22, 0.0 }
 0x241   : > { %v3523_v24 = vpack.c.bf16 %v3499_v12, %v3497_v11 }
 0x242   : > { %v3524_v44 = vpack.c.bf16 %v3500_v13, %v3498_v23  ;;  %v3446_v25 = vpop.f32.mrb[16].mxu0  ;;  %v4644_v23 = vadd.f32 %v6419_v38, %v6433_v48  ;;  %v4646_v13 = vadd.f32 %v6421_v39, %v6435_v49 }
 0x243   : > { %v4621_v45 = vadd.f32 %v4620_v43, %v3446_v25  ;;  %v3448_v16 = vpop.f32.mrb[17].mxu0  ;;  %v4650_v25 = vadd.f32 %v6425_v41, %v6435_v49  ;;  %v5280_v41 = vld [vmem:[%s6616_s5 + $0x20] sm:$0xff]   ;;  %v5282_v49 = vld [vmem:[%s6616_s5 + $0x30] sm:$0xff]  }
 0x244   : > { %v4623_v47 = vadd.f32 %v4622_v14, %v3448_v16  ;;  %v3450_v17 = vpop.f32.mrb[18].mxu0  ;;  %3724 = vmatprep.mubr.bf16.mxu1 %v3524_v44 }
 0x245   : > { %v4625_v50 = vadd.f32 %v4624_v15, %v3450_v17  ;;  %v3452_v51 = vpop.f32.mrb[19].mxu0  ;;  %3725 = vmatmul.mubr.bf16.gmra.mrb[44].mxu1 %v3523_v24  ;;  %v3501_v52 = vmax.f32 %v4621_v45, 0.0  ;;  %v4648_v24 = vadd.f32 %v6423_v40, %v6433_v48  ;;  %v5279_v40 = vld [vmem:[%s6616_s5 + $0x18] sm:$0xff]   ;;  %v5281_v48 = vld [vmem:[%s6616_s5 + $0x28] sm:$0xff]  }
 0x246   : > { %v4627_v26 = vadd.f32 %v4626_v46, %v3452_v51  ;;  %v3502_v27 = vmax.f32 %v4623_v47, 0.0  ;;  %4562 = vmatprep.subr.bf16.mxu1 %v5279_v40 }
 0x247   : > { %v3503_v53 = vmax.f32 %v4625_v50, 0.0  ;;  %4563 = vmatpush3.bf16.msra.mxu1 %v5279_v40 }
 0x248   : > { %v3504_v42 = vmax.f32 %v4627_v26, 0.0  ;;  %4564 = vmatprep.subr.bf16.mxu1 %v5280_v41 }
 0x249   : > { %v3525_v28 = vpack.c.bf16 %v3503_v53, %v3501_v52  ;;  %v5283_v52 = vld [vmem:[%s6616_s5 + $0x38] sm:$0xff]  }
 0x24a   : > { %v3526_v56 = vpack.c.bf16 %v3504_v42, %v3502_v27  ;;  %v3456_v29 = vpop.f32.mrb[20].mxu0  ;;  %v6517_v27 = vld [vmem:[%s6615_s4] ss:$0 sm:$0xff] }
 0x24b   : > { %v4629_v58 = vadd.f32 %v4628_v54, %v3456_v29  ;;  %v3458_v18 = vpop.f32.mrb[21].mxu0  ;;  %4565 = vmatpush3.bf16.msra.mxu1 %v5280_v41 }
 0x24c   : > { %v4631_v60 = vadd.f32 %v4630_v55, %v3458_v18  ;;  %v3460_v19 = vpop.f32.mrb[22].mxu0  ;;  %3732 = vmatprep.mubr.bf16.mxu1 %v3526_v56  ;;  %4566 = vmatprep.subr.bf16.mxu1 %v5281_v48 }
 0x24d   : > { %v4633_v61 = vadd.f32 %v4632_v57, %v3460_v19  ;;  %v3462_v62 = vpop.f32.mrb[23].mxu0  ;;  %3733 = vmatmul.mubr.bf16.gmra.mrb[48].mxu1 %v3525_v28  ;;  %v3505_v63 = vmax.f32 %v4629_v58, 0.0 }
 0x24e   : > { %v4635_v30 = vadd.f32 %v4634_v59, %v3462_v62  ;;  %v3506_v31 = vmax.f32 %v4631_v60, 0.0 }
 0x24f   : > { %v3507_v20 = vmax.f32 %v4633_v61, 0.0  ;;  %4567 = vmatpush3.bf16.msra.mxu1 %v5281_v48 }
 0x250   : > { %v3508_v0 = vmax.f32 %v4635_v30, 0.0  ;;  %4568 = vmatprep.subr.bf16.mxu1 %v5282_v49 }
 0x251   : > { %v3527_v32 = vpack.c.bf16 %v3507_v20, %v3505_v63 }
 0x252   : > { %v3528_v2 = vpack.c.bf16 %v3508_v0, %v3506_v31  ;;  %v3466_v33 = vpop.f32.mrb[24].mxu0 }
 0x253   : > { %v4637_v4 = vadd.f32 %v4636_v1, %v3466_v33  ;;  %v3468_v5 = vpop.f32.mrb[25].mxu0  ;;  %4569 = vmatpush3.bf16.msra.mxu1 %v5282_v49 }
 0x254   : > { %v4639_v7 = vadd.f32 %v4638_v21, %v3468_v5  ;;  %v3470_v8 = vpop.f32.mrb[26].mxu0  ;;  %3740 = vmatprep.mubr.bf16.mxu1 %v3528_v2  ;;  %4570 = vmatprep.subr.bf16.mxu1 %v5283_v52 }
 0x255   : > { %v4641_v9 = vadd.f32 %v4640_v3, %v3470_v8  ;;  %v3472_v10 = vpop.f32.mrb[27].mxu0  ;;  %3741 = vmatmul.mubr.bf16.gmra.mrb[52].mxu1 %v3527_v32  ;;  %v3509_v22 = vmax.f32 %v4637_v4, 0.0 }
 0x256   : > { %v4643_v34 = vadd.f32 %v4642_v6, %v3472_v10  ;;  %v3510_v35 = vmax.f32 %v4639_v7, 0.0 }
 0x257   : > { %v3511_v11 = vmax.f32 %v4641_v9, 0.0  ;;  %4571 = vmatpush3.bf16.msra.mxu1 %v5283_v52 }
 0x258   : > { %v3512_v12 = vmax.f32 %v4643_v34, 0.0 }
 0x259   : > { %v3529_v36 = vpack.c.bf16 %v3511_v11, %v3509_v22 }
 0x25a   : > { %v3530_v43 = vpack.c.bf16 %v3512_v12, %v3510_v35  ;;  %v3476_v37 = vpop.f32.mrb[28].mxu0 }
 0x25b   : > { %v4645_v14 = vadd.f32 %v4644_v23, %v3476_v37  ;;  %v3478_v44 = vpop.f32.mrb[29].mxu0 }
 0x25c   : > { %v4647_v15 = vadd.f32 %v4646_v13, %v3478_v44  ;;  %v3480_v45 = vpop.f32.mrb[30].mxu0  ;;  %3748 = vmatprep.mubr.bf16.mxu1 %v3530_v43 }
 0x25d   : > { %v4649_v16 = vadd.f32 %v4648_v24, %v3480_v45  ;;  %v3482_v46 = vpop.f32.mrb[31].mxu0  ;;  %3749 = vmatmul.mubr.bf16.gmra.mrb[56].mxu1 %v3529_v36  ;;  %v3513_v47 = vmax.f32 %v4645_v14, 0.0 }
 0x25e   : > { %v4651_v38 = vadd.f32 %v4650_v25, %v3482_v46  ;;  %v3514_v39 = vmax.f32 %v4647_v15, 0.0 }
 0x25f   : > { %v3515_v17 = vmax.f32 %v4649_v16, 0.0 }
 0x260   : > { %v3516_v50 = vmax.f32 %v4651_v38, 0.0 }
 0x261   : > { %v3531_v51 = vpack.c.bf16 %v3515_v17, %v3513_v47 }
 0x262   : > { %v3532_v26 = vpack.c.bf16 %v3516_v50, %v3514_v39 }
 0x264   : > { %3756 = vmatprep.mubr.bf16.mxu1 %v3532_v26 }
 0x265   : > { %3757 = vmatmul.mubr.bf16.gmra.mrb[60].mxu1 %v3531_v51 }
 0x300   : > { %v4492_v53 = vpop.f32.mrb[32].mxu1 }
 0x301   : > { %v4493_v42 = vpop.f32.mrb[33].mxu1 }
 0x302   : > { %v4494_v54 = vadd.f32 %v4493_v42, %v4492_v53  ;;  %v4495_v28 = vpop.f32.mrb[34].mxu1 }
 0x303   : > { %v4496_v55 = vpop.f32.mrb[35].mxu1 }
 0x304   : > { %v3703_v56 = vadd.f32 %v4494_v54, %v6517_v27  ;;  %v4497_v29 = vadd.f32 %v4496_v55, %v4495_v28 }
 0x306   : > { %v3706_v57 = vadd.f32 %v4497_v29, %v6517_v27  ;;  %v3765_v58 = vmax.f32 %v3703_v56, 0.0 }
 0x308   : > { %v3766_v18 = vmax.f32 %v3706_v57, 0.0  ;;  %v4498_v59 = vpop.f32.mrb[36].mxu1 }
 0x309   : > { %v4499_v60 = vpop.f32.mrb[37].mxu1 }
 0x30a   : > { %v4500_v19 = vadd.f32 %v4499_v60, %v4498_v59  ;;  %v4501_v61 = vpop.f32.mrb[38].mxu1  ;;  %v3781_v62 = vpack.c.bf16 %v3766_v18, %v3765_v58 }
 0x30b   : > { %v4502_v30 = vpop.f32.mrb[39].mxu1 }
 0x30c   : > { %v3711_v63 = vadd.f32 %v4500_v19, %v6517_v27  ;;  %v4503_v20 = vadd.f32 %v4502_v30, %v4501_v61  ;;  %4572 = vmatprep.mubr.bf16.mxu1 %v3781_v62 }
 0x30e   : > { %v3714_v31 = vadd.f32 %v4503_v20, %v6517_v27  ;;  %v3767_v0 = vmax.f32 %v3711_v63, 0.0 }
 0x310   : > { %v3768_v1 = vmax.f32 %v3714_v31, 0.0  ;;  %v4504_v32 = vpop.f32.mrb[40].mxu1 }
 0x311   : > { %v4505_v21 = vpop.f32.mrb[41].mxu1 }
 0x312   : > { %v3782_v2 = vpack.c.bf16 %v3768_v1, %v3767_v0  ;;  %v4506_v33 = vadd.f32 %v4505_v21, %v4504_v32  ;;  %v4507_v3 = vpop.f32.mrb[42].mxu1 }
 0x313   : > { %v4508_v4 = vpop.f32.mrb[43].mxu1 }
 0x314   : > { %v3719_v5 = vadd.f32 %v4506_v33, %v6517_v27  ;;  %v4509_v6 = vadd.f32 %v4508_v4, %v4507_v3  ;;  %4573 = vmatmul.mubr.bf16.vlgmr.msra.gmra.mrb[64].mxu1 %v3782_v2  ;;  %v4460_v3 = vld [vmem:[%s6617_s6] ss:$0 sm:$0xff] }
 0x316   : > { %v3722_v7 = vadd.f32 %v4509_v6, %v6517_v27  ;;  %v3769_v8 = vmax.f32 %v3719_v5, 0.0 }
 0x318   : > { %v3770_v9 = vmax.f32 %v3722_v7, 0.0  ;;  %v4510_v10 = vpop.f32.mrb[44].mxu1 }
 0x319   : > { %v4511_v34 = vpop.f32.mrb[45].mxu1 }
 0x31a   : > { %v4512_v22 = vadd.f32 %v4511_v34, %v4510_v10  ;;  %v4513_v11 = vpop.f32.mrb[46].mxu1  ;;  %v3783_v35 = vpack.c.bf16 %v3770_v9, %v3769_v8 }
 0x31b   : > { %v4514_v12 = vpop.f32.mrb[47].mxu1 }
 0x31c   : > { %v3727_v23 = vadd.f32 %v4512_v22, %v6517_v27  ;;  %v4515_v36 = vadd.f32 %v4514_v12, %v4513_v11  ;;  %4576 = vmatprep.mubr.bf16.mxu1 %v3783_v35 }
 0x31e   : > { %v3730_v13 = vadd.f32 %v4515_v36, %v6517_v27  ;;  %v3771_v43 = vmax.f32 %v3727_v23, 0.0 }
 0x320   : > { %v3772_v37 = vmax.f32 %v3730_v13, 0.0  ;;  %v4516_v24 = vpop.f32.mrb[48].mxu1 }
 0x321   : > { %v4517_v14 = vpop.f32.mrb[49].mxu1 }
 0x322   : > { %v4518_v44 = vadd.f32 %v4517_v14, %v4516_v24  ;;  %v4519_v25 = vpop.f32.mrb[50].mxu1  ;;  %v3784_v15 = vpack.c.bf16 %v3772_v37, %v3771_v43 }
 0x323   : > { %v4520_v45 = vpop.f32.mrb[51].mxu1 }
 0x324   : > { %v3735_v16 = vadd.f32 %v4518_v44, %v6517_v27  ;;  %v4521_v46 = vadd.f32 %v4520_v45, %v4519_v25  ;;  %4577 = vmatmul.mubr.bf16.gmra.mrb[68].mxu1 %v3784_v15 }
 0x326   : > { %v3738_v38 = vadd.f32 %v4521_v46, %v6517_v27  ;;  %v3773_v47 = vmax.f32 %v3735_v16, 0.0 }
 0x328   : > { %v3774_v17 = vmax.f32 %v3738_v38, 0.0  ;;  %v4522_v39 = vpop.f32.mrb[52].mxu1 }
 0x329   : > { %v4523_v50 = vpop.f32.mrb[53].mxu1 }
 0x32a   : > { %v4524_v51 = vadd.f32 %v4523_v50, %v4522_v39  ;;  %v4525_v26 = vpop.f32.mrb[54].mxu1  ;;  %v3785_v40 = vpack.c.bf16 %v3774_v17, %v3773_v47 }
 0x32b   : > { %v4526_v41 = vpop.f32.mrb[55].mxu1 }
 0x32c   : > { %v3743_v48 = vadd.f32 %v4524_v51, %v6517_v27  ;;  %v4527_v49 = vadd.f32 %v4526_v41, %v4525_v26  ;;  %4580 = vmatprep.mubr.bf16.mxu1 %v3785_v40 }
 0x32e   : > { %v3746_v52 = vadd.f32 %v4527_v49, %v6517_v27  ;;  %v3775_v53 = vmax.f32 %v3743_v48, 0.0 }
 0x330   : > { %v3776_v42 = vmax.f32 %v3746_v52, 0.0  ;;  %v4528_v54 = vpop.f32.mrb[56].mxu1 }
 0x331   : > { %v4529_v28 = vpop.f32.mrb[57].mxu1 }
 0x332   : > { %v4530_v55 = vadd.f32 %v4529_v28, %v4528_v54  ;;  %v4531_v56 = vpop.f32.mrb[58].mxu1  ;;  %v3786_v29 = vpack.c.bf16 %v3776_v42, %v3775_v53 }
 0x333   : > { %v4532_v57 = vpop.f32.mrb[59].mxu1 }
 0x334   : > { %v3751_v58 = vadd.f32 %v4530_v55, %v6517_v27  ;;  %v4533_v18 = vadd.f32 %v4532_v57, %v4531_v56  ;;  %4581 = vmatmul.mubr.bf16.gmra.mrb[72].mxu1 %v3786_v29 }
 0x336   : > { %v3754_v59 = vadd.f32 %v4533_v18, %v6517_v27  ;;  %v3777_v60 = vmax.f32 %v3751_v58, 0.0 }
 0x338   : > { %v3778_v19 = vmax.f32 %v3754_v59, 0.0  ;;  %v4534_v61 = vpop.f32.mrb[60].mxu1 }
 0x339   : > { %v4535_v62 = vpop.f32.mrb[61].mxu1 }
 0x33a   : > { %v4536_v30 = vadd.f32 %v4535_v62, %v4534_v61  ;;  %v4537_v63 = vpop.f32.mrb[62].mxu1  ;;  %v3787_v20 = vpack.c.bf16 %v3778_v19, %v3777_v60 }
 0x33b   : > { %v4538_v31 = vpop.f32.mrb[63].mxu1 }
 0x33c   : > { %v3759_v0 = vadd.f32 %v4536_v30, %v6517_v27  ;;  %v4539_v1 = vadd.f32 %v4538_v31, %v4537_v63  ;;  %4584 = vmatprep.mubr.bf16.mxu1 %v3787_v20 }
 0x33e   : > { %v3762_v32 = vadd.f32 %v4539_v1, %v6517_v27  ;;  %v3779_v21 = vmax.f32 %v3759_v0, 0.0 }
 0x340   : > { %v3780_v2 = vmax.f32 %v3762_v32, 0.0 }
 0x342   : > { %v3788_v33 = vpack.c.bf16 %v3780_v2, %v3779_v21 }
 0x344   : > { %4585 = vmatmul.mubr.bf16.gmra.mrb[76].mxu1 %v3788_v33 }
 0x3e7   : > { %v4574_v4 = vpop.f32.mrb[64].mxu1 }
 0x3e8   : > { %v3903_v5 = vadd.f32 %v4574_v4, %v4460_v3  ;;  %v3894_v6 = vpop.f32.mrb[65].mxu1 }
 0x3e9   : > { %v3895_v7 = vadd.f32 %v4460_v3, %v3894_v6  ;;  %v4575_v8 = vpop.f32.mrb[66].mxu1 }
 0x3ea   : > { %3959 = vst [vmem:[%s6541_s21 + $0x10] sm:$0xff] %v3903_v5  ;;  %v3906_v27 = vadd.f32 %v4575_v8, %v4460_v3  ;;  %v3897_v9 = vpop.f32.mrb[67].mxu1 }
 0x3eb   : > { %3957 = vst [vmem:[%s6541_s21] sm:$0xff] %v3895_v7  ;;  %v3898_v10 = vadd.f32 %v4460_v3, %v3897_v9 }
 0x3ec   : > { %3960 = vst [vmem:[%s6541_s21 + $0x18] sm:$0xff] %v3906_v27 }
 0x3ed   : > { %3958 = vst [vmem:[%s6541_s21 + $0x8] sm:$0xff] %v3898_v10 }
 0x3f7   : > { %v4578_v34 = vpop.f32.mrb[68].mxu1 }
 0x3f8   : > { %v3919_v22 = vadd.f32 %v4578_v34, %v4460_v3  ;;  %v3910_v11 = vpop.f32.mrb[69].mxu1 }
 0x3f9   : > { %v3911_v35 = vadd.f32 %v4460_v3, %v3910_v11  ;;  %v4579_v12 = vpop.f32.mrb[70].mxu1 }
 0x3fa   : > { %3963 = vst [vmem:[%s6541_s21 + $0x30] sm:$0xff] %v3919_v22  ;;  %v3922_v23 = vadd.f32 %v4579_v12, %v4460_v3  ;;  %v3913_v36 = vpop.f32.mrb[71].mxu1 }
 0x3fb   : > { %3961 = vst [vmem:[%s6541_s21 + $0x20] sm:$0xff] %v3911_v35  ;;  %v3914_v13 = vadd.f32 %v4460_v3, %v3913_v36 }
 0x3fc   : > { %3964 = vst [vmem:[%s6541_s21 + $0x38] sm:$0xff] %v3922_v23 }
 0x3fd   : > { %3962 = vst [vmem:[%s6541_s21 + $0x28] sm:$0xff] %v3914_v13 }
 0x407   : > { %v4582_v43 = vpop.f32.mrb[72].mxu1 }
 0x408   : > { %v3935_v37 = vadd.f32 %v4582_v43, %v4460_v3  ;;  %v3926_v24 = vpop.f32.mrb[73].mxu1 }
 0x409   : > { %v3927_v14 = vadd.f32 %v4460_v3, %v3926_v24  ;;  %v4583_v44 = vpop.f32.mrb[74].mxu1 }
 0x40a   : > { %3967 = vst [vmem:[%s6541_s21 + $0x50] sm:$0xff] %v3935_v37  ;;  %v3938_v25 = vadd.f32 %v4583_v44, %v4460_v3  ;;  %v3929_v15 = vpop.f32.mrb[75].mxu1 }
 0x40b   : > { %3965 = vst [vmem:[%s6541_s21 + $0x40] sm:$0xff] %v3927_v14  ;;  %v3930_v45 = vadd.f32 %v4460_v3, %v3929_v15 }
 0x40c   : > { %3968 = vst [vmem:[%s6541_s21 + $0x58] sm:$0xff] %v3938_v25 }
 0x40d   : > { %3966 = vst [vmem:[%s6541_s21 + $0x48] sm:$0xff] %v3930_v45 }
 0x417   : > { %v4586_v16 = vpop.f32.mrb[76].mxu1 }
 0x418   : > { %v3951_v46 = vadd.f32 %v4586_v16, %v4460_v3  ;;  %v3942_v38 = vpop.f32.mrb[77].mxu1 }
 0x419   : > { %v3943_v47 = vadd.f32 %v4460_v3, %v3942_v38  ;;  %v4587_v17 = vpop.f32.mrb[78].mxu1 }
 0x41a   : > { %3971 = vst [vmem:[%s6541_s21 + $0x70] sm:$0xff] %v3951_v46  ;;  %v3954_v39 = vadd.f32 %v4587_v17, %v4460_v3  ;;  %v3945_v50 = vpop.f32.mrb[79].mxu1 }
 0x41b   : > { %3969 = vst [vmem:[%s6541_s21 + $0x60] sm:$0xff] %v3943_v47  ;;  %v3946_v51 = vadd.f32 %v4460_v3, %v3945_v50 }
 0x41c   : > { %3972 = vst [vmem:[%s6541_s21 + $0x78] sm:$0xff] %v3954_v39 }
 0x41d   : > { %3970 = vst [vmem:[%s6541_s21 + $0x68] sm:$0xff] %v3946_v51 }
 0x41e   : > { %5297 = shalt.err (!%p5294_p3)
}
 0x41f   : > { %s5298_s16 = scalar_lea.hbm %s6561_s8, 2048  ;;  %s5302_s20 = scalar_lea.hbm %s6618_s7, 4096 }
 0x420   : > { %p5299_p4 = scmp.ne.s32.totalorder %s6561_s8, %s5298_s16  ;;  %p5303_p9 = scmp.lt.u32.totalorder %s6561_s8, %s6618_s7 }
 0x421   : > { %p5304_p10 = scmp.lt.u32.totalorder %s5302_s20, %s5298_s16  ;;  %p5306_p12 = scmp.lt.u32.totalorder %s5298_s16, %s6561_s8 }
 0x422   : > { %p5300_p7 = pnand %p5299_p4, %p5429_p5 }
 0x423   : > { %p5305_p11 = por %p5304_p10, %p5303_p9 }
 0x424   : > { %p5301_p8 = pneg %p5300_p7 }
 0x425   : > { %p5307_p13 = por %p5306_p12, %p5305_p11 }
 0x427   : > { %p5308_p0 = pnand %p5307_p13, %p5301_p8 }
 0x429   : > { %5311 = shalt.err (!%p5308_p0)
}
 0x42a   : > { %s5349_s29 = smov 128   ;;  %s5350_s23 = smov 8  }
 0x42b   : > { %4844 = dma.vmem_to_hbm [thread:$0]  (%p5429_p5), %s6563_s17, 2048, %s6561_s8, %s6570_s28, %s5349_s29, %s5349_s29, %s5350_s23  }
 0x42c PF: > { %p4850_p1 = scmp.ge.s32.totalorder %s5346_s27, 2  ;;  %s4002_s9 = sand.u32 1, %s5334_s24  }
 0x42d   : > { %s4003_s14 = scalar_lea.sflag [#allocation3], %s4002_s9 }
 0x42e   : > { %p4847_p2 = pnand %p4850_p1, %p5433_p6 }
 0x430   : > { %5329 = dma.done.wait (!%p4847_p2), %s4003_s14, 2048  }
 0x431   : > { %5331 = vsyncadd (!%p4847_p2), %s4003_s14, 4294965248  ;;  %p17_p3 = scmp.ge.s32.totalorder %s5416_s30, 4   ;;  %s6621_s24 = smov %s5338_s25 }
 0x432   : > { %s6622_s25 = smov %s5342_s26  ;;  %s6623_s26 = smov %s5427_s10 }
 0x433   : > { %s6624_s27 = smov %s5416_s30  ;;  %19 = sbr.rel (!%p17_p3) target bundleno = 3 (0x3), region = 83 }
 0x43a   :  { %4008 = vsyncpa [#allocation3], 1 }
 0x43b   :  { %4010 = vsyncpa [#allocation3 + $0x1], 1 }

</bundles_post_ra>
